<compile_context>
chip_gen: v7x
topology: tpu7x:2x2x1
jax: 0.10.0
libtpu: 0.0.40
codegen_flags: <defaults>
</compile_context>

<pallas_src>
import numpy as np
import jax
import jax.numpy as jnp
from jax.experimental import pallas as pl
from jax.experimental.pallas import tpu as pltpu

D = 768                 # RoBERTa hidden size (fixed by the module's Linear layers)
P = 1024                # projection size
VOCAB = 64              # small synthetic vocab for the RoBERTa stand-in
NUM_RELATION_TYPES = 10
W_DTYPE = jnp.bfloat16  # weight storage dtype (f32 accumulation everywhere)

# Order of the stacked relation weights (index = torch relation id - 1):
RELATION_NAMES = [
    "conjuction", "alternative", "restatement", "instantiation", "contrast",
    "concession", "analogy", "temporal", "condition", "causal",
]

# --- small compatibility shims ----------------------------------------------
_CompilerParams = getattr(pltpu, "CompilerParams", None) or getattr(
    pltpu, "TPUCompilerParams", None)


def _mosaic_params(**kw):
    return None if _CompilerParams is None else _CompilerParams(**kw)


def _approx_reciprocal(x):
    if hasattr(pl, "reciprocal"):
        return pl.reciprocal(x, approx=True)   # EUP slot (free vs VALU)
    return 1.0 / x


def _vmem_capacity_bytes():
    try:
        return int(pltpu.get_tpu_info().vmem_capacity_bytes)
    except Exception:
        return 0


# ----------------------------- masked mean pool -----------------------------

def _masked_mean_pool_kernel(emb_ref, mask_ref, o_ref):
    emb = emb_ref[...]                                   # (TN, S, D)  f32
    mask = mask_ref[...]                                 # (TN, S, 1)  f32 (lane-bcast)
    masked_sum = jnp.sum(emb * mask, axis=1)             # (TN, D)
    counts = jnp.maximum(jnp.sum(mask, axis=1), 1.0)     # (TN, 1) guard all-padding rows
    o_ref[...] = masked_sum * _approx_reciprocal(counts)


def pallas_masked_mean_pool(token_emb, mask, tile_n=8):
    """Mean pooling over non-padding tokens. token_emb:(N,S,D), mask:(N,S) -> (N,D)."""
    N, S, Dh = token_emb.shape
    mask3 = mask.astype(jnp.float32)[:, :, None]          # pre-expand: no in-kernel relayout
    n_pad = (-N) % tile_n
    if n_pad:
        token_emb = jnp.pad(token_emb, ((0, n_pad), (0, 0), (0, 0)))
        mask3 = jnp.pad(mask3, ((0, n_pad), (0, 0), (0, 0)))
    Np = N + n_pad
    out = pl.pallas_call(
        _masked_mean_pool_kernel,
        out_shape=jax.ShapeDtypeStruct((Np, Dh), jnp.float32),
        grid=(Np // tile_n,),
        in_specs=[
            pl.BlockSpec((tile_n, S, Dh), lambda i: (i, 0, 0)),
            pl.BlockSpec((tile_n, S, 1), lambda i: (i, 0, 0)),
        ],
        out_specs=pl.BlockSpec((tile_n, Dh), lambda i: (i, 0)),
        compiler_params=_mosaic_params(dimension_semantics=("parallel",)),
    )(token_emb, mask3)
    return out[:N]


# ----------------------------- batched subtree chain ------------------------

def _subtree_chain_kernel(rel_ref, first_ref, row_ref,        # SMEM scalar prefetch
                          la_ref, kw_ref, ra_ref,             # (R, D) f32, resident
                          wtt_ref, btt_ref,                    # (2D, D) bf16 / (1, D) f32
                          wrel_ref, brel_ref,                  # selected (3D, D) bf16 / (1, D)
                          o_ref,                               # (num_sents, D) f32, resident
                          tmp_ref):                            # (1, D) f32 scratch
    del rel_ref  # relation id is consumed by the weight BlockSpec index_map only
    k = pl.program_id(0)
    row = row_ref[k]
    is_first = first_ref[k]

    @pl.when(k == 0)
    def _():
        # zero the whole resident output so sentences without relations stay 0
        o_ref[...] = jnp.zeros_like(o_ref)

    left = la_ref[pl.ds(k, 1), :].astype(W_DTYPE)
    keyw = kw_ref[pl.ds(k, 1), :].astype(W_DTYPE)
    right = ra_ref[pl.ds(k, 1), :]                             # f32

    # Recurrence-independent partial first: overlaps the next weight-slice DMA and
    # keeps the per-step serial critical path to the two carry-dependent GEMVs.
    partial = (jnp.dot(left, wrel_ref[0:D, :], preferred_element_type=jnp.float32)
               + jnp.dot(keyw, wrel_ref[D:2 * D, :], preferred_element_type=jnp.float32)
               + brel_ref[...])

    @pl.when(is_first == 1)
    def _():
        # first relation of this sentence: lower_subtree_flag == 0
        tmp_ref[...] = right

    @pl.when(is_first == 0)
    def _():
        # lower_subtree_flag == 1: right' = W_text_tree(cat(right, prev_subtree))
        prev = o_ref[pl.ds(row, 1), :]
        tmp_ref[...] = (
            jnp.dot(right.astype(W_DTYPE), wtt_ref[0:D, :],
                    preferred_element_type=jnp.float32)
            + jnp.dot(prev.astype(W_DTYPE), wtt_ref[D:2 * D, :],
                      preferred_element_type=jnp.float32)
            + btt_ref[...])

    o_ref[pl.ds(row, 1), :] = partial + jnp.dot(
        tmp_ref[...].astype(W_DTYPE), wrel_ref[2 * D:3 * D, :],
        preferred_element_type=jnp.float32)


def _subtree_chain_kernel_pinned(rel_ref, first_ref, row_ref,
                                 la_ref, kw_ref, ra_ref,
                                 wtt_ref, btt_ref,
                                 wrel_hbm_ref,                 # (10*3D, D) bf16 in HBM
                                 brel_ref,                     # selected (1, D) f32
                                 o_ref, tmp_ref, wrel_vmem, dma_sem):
    k = pl.program_id(0)

    @pl.when(k == 0)
    def _():
        o_ref[...] = jnp.zeros_like(o_ref)
        # one-shot DMA: pin the full relation-weight stack in VMEM for the chain
        cp = pltpu.make_async_copy(wrel_hbm_ref, wrel_vmem, dma_sem)
        cp.start()
        cp.wait()

    r = rel_ref[k]
    row = row_ref[k]
    is_first = first_ref[k]
    base = pl.multiple_of(r * (3 * D), 3 * D)

    left = la_ref[pl.ds(k, 1), :].astype(W_DTYPE)
    keyw = kw_ref[pl.ds(k, 1), :].astype(W_DTYPE)
    right = ra_ref[pl.ds(k, 1), :]

    partial = (jnp.dot(left, wrel_vmem[pl.ds(base, D), :],
                       preferred_element_type=jnp.float32)
               + jnp.dot(keyw, wrel_vmem[pl.ds(base + D, D), :],
                         preferred_element_type=jnp.float32)
               + brel_ref[...])

    @pl.when(is_first == 1)
    def _():
        tmp_ref[...] = right

    @pl.when(is_first == 0)
    def _():
        prev = o_ref[pl.ds(row, 1), :]
        tmp_ref[...] = (
            jnp.dot(right.astype(W_DTYPE), wtt_ref[0:D, :],
                    preferred_element_type=jnp.float32)
            + jnp.dot(prev.astype(W_DTYPE), wtt_ref[D:2 * D, :],
                      preferred_element_type=jnp.float32)
            + btt_ref[...])

    o_ref[pl.ds(row, 1), :] = partial + jnp.dot(
        tmp_ref[...].astype(W_DTYPE), wrel_vmem[pl.ds(base + 2 * D, D), :],
        preferred_element_type=jnp.float32)


def pallas_subtree_chain_batched(params, la, kw, ra, rel0, is_first, out_row,
                                 num_sents, *, pin_stack=None):
    """Runs every sentence's subtree recursion in ONE grid-looped pallas_call.

    la/kw/ra: (R, D) f32 pooled embeddings for all relations (batch order),
    rel0: (R,) 0-based relation ids, is_first: (R,) segment-start flags,
    out_row: (R,) sentence index each relation belongs to.
    Returns (num_sents, D) f32 (rows of sentences without relations are zeros).
    """
    R = int(la.shape[0])
    if pin_stack is None:
        # Pin the 10x(3D)xD bf16 stack (~34 MB) only when the chain is long enough
        # to amortize the one-shot DMA and the chip has 128 MiB VMEM (v5e/v6e);
        # on v7x (64 MiB) keep the per-step sliced DMA (perf-review guidance).
        pin_stack = (R > NUM_RELATION_TYPES) and (_vmem_capacity_bytes() >= 96 * 2 ** 20)

    rel0 = jnp.asarray(rel0, jnp.int32)
    is_first = jnp.asarray(is_first, jnp.int32)
    out_row = jnp.asarray(out_row, jnp.int32)

    const2 = lambda k, rel, first, row: (0, 0)
    rel_w_map = lambda k, rel, first, row: (rel[k], 0, 0)

    if not pin_stack:
        grid_spec = pltpu.PrefetchScalarGridSpec(
            num_scalar_prefetch=3,
            grid=(R,),
            in_specs=[
                pl.BlockSpec((R, D), const2),                 # left args   (resident)
                pl.BlockSpec((R, D), const2),                 # keywords    (resident)
                pl.BlockSpec((R, D), const2),                 # right args  (resident)
                pl.BlockSpec((2 * D, D), const2),             # W_text_tree (resident)
                pl.BlockSpec((1, D), const2),                 # b_text_tree
                pl.BlockSpec((None, 3 * D, D), rel_w_map),    # selected relation W slice
                pl.BlockSpec((None, 1, D), rel_w_map),        # selected relation bias
            ],
            out_specs=pl.BlockSpec((num_sents, D), const2),
            scratch_shapes=[pltpu.VMEM((1, D), jnp.float32)],
        )
        return pl.pallas_call(
            _subtree_chain_kernel,
            out_shape=jax.ShapeDtypeStruct((num_sents, D), jnp.float32),
            grid_spec=grid_spec,
            compiler_params=_mosaic_params(dimension_semantics=("arbitrary",)),
        )(rel0, is_first, out_row, la, kw, ra,
          params["W_text_tree"], params["b_text_tree"],
          params["W_rel_stack"], params["b_rel_stack"])

    # --- VMEM-pinned relation-stack path (long chains, 128 MiB-VMEM chips) ----
    wrel_flat = params["W_rel_stack"].reshape(NUM_RELATION_TYPES * 3 * D, D)
    grid_spec = pltpu.PrefetchScalarGridSpec(
        num_scalar_prefetch=3,
        grid=(R,),
        in_specs=[
            pl.BlockSpec((R, D), const2),
            pl.BlockSpec((R, D), const2),
            pl.BlockSpec((R, D), const2),
            pl.BlockSpec((2 * D, D), const2),
            pl.BlockSpec((1, D), const2),
            pl.BlockSpec(memory_space=pl.ANY),                # stack stays in HBM
            pl.BlockSpec((None, 1, D), rel_w_map),
        ],
        out_specs=pl.BlockSpec((num_sents, D), const2),
        scratch_shapes=[
            pltpu.VMEM((1, D), jnp.float32),
            pltpu.VMEM((NUM_RELATION_TYPES * 3 * D, D), W_DTYPE),
            pltpu.SemaphoreType.DMA,
        ],
    )
    return pl.pallas_call(
        _subtree_chain_kernel_pinned,
        out_shape=jax.ShapeDtypeStruct((num_sents, D), jnp.float32),
        grid_spec=grid_spec,
        compiler_params=_mosaic_params(dimension_semantics=("arbitrary",),
                                       vmem_limit_bytes=64 * 1024 * 1024),
    )(rel0, is_first, out_row, la, kw, ra,
      params["W_text_tree"], params["b_text_tree"],
      wrel_flat, params["b_rel_stack"])


# ----------------------------- fused epilogue -------------------------------

def _epilogue_kernel(sent_ref, sub_ref, wtt_row_ref, wplain_row_ref,
                     wtt_ref, btt_ref, w1_ref, b1_ref, w2_ref, b2_ref, o_ref):
    # tree = sum_i [ wtt_row_i * W_text_tree(cat(sent_i, sub_i)) + wplain_row_i * sent_i ]
    # (the 1/num_sents scale is folded into the row weights), then both projections.
    sent = sent_ref[...]                                       # (ns, D) f32
    sub = sub_ref[...]                                         # (ns, D) f32
    tt = (jnp.dot(sent.astype(W_DTYPE), wtt_ref[0:D, :],
                  preferred_element_type=jnp.float32)
          + jnp.dot(sub.astype(W_DTYPE), wtt_ref[D:2 * D, :],
                    preferred_element_type=jnp.float32)
          + btt_ref[...])
    tree = jnp.sum(wtt_row_ref[...] * tt + wplain_row_ref[...] * sent,
                   axis=0, keepdims=True)                      # (1, D)
    h = (jnp.dot(tree.astype(W_DTYPE), w1_ref[...],
                 preferred_element_type=jnp.float32) + b1_ref[...])
    o_ref[...] = (jnp.dot(h.astype(W_DTYPE), w2_ref[...],
                          preferred_element_type=jnp.float32) + b2_ref[...])


def pallas_fused_epilogue(params, sent_emb, sub_emb, wtt_rows, wplain_rows):
    ns = sent_emb.shape[0]
    return pl.pallas_call(
        _epilogue_kernel,
        out_shape=jax.ShapeDtypeStruct((1, P), jnp.float32),
        grid=(1,),
        in_specs=[
            pl.BlockSpec((ns, D), lambda i: (0, 0)),
            pl.BlockSpec((ns, D), lambda i: (0, 0)),
            pl.BlockSpec((ns, 1), lambda i: (0, 0)),
            pl.BlockSpec((ns, 1), lambda i: (0, 0)),
            pl.BlockSpec((2 * D, D), lambda i: (0, 0)),
            pl.BlockSpec((1, D), lambda i: (0, 0)),
            pl.BlockSpec((D, P), lambda i: (0, 0)),
            pl.BlockSpec((1, P), lambda i: (0, 0)),
            pl.BlockSpec((P, P), lambda i: (0, 0)),
            pl.BlockSpec((1, P), lambda i: (0, 0)),
        ],
        out_specs=pl.BlockSpec((1, P), lambda i: (0, 0)),
    )(sent_emb, sub_emb, wtt_rows, wplain_rows,
      params["W_text_tree"], params["b_text_tree"],
      params["W_proj1"], params["b_proj1"],
      params["W_proj2"], params["b_proj2"])


# ----------------------------- parameter setup ------------------------------

def _xavier_uniform(key, fan_in, fan_out):
    # Matches nn.init.xavier_uniform_ on an (out,in) torch weight; stored here
    # transposed as (in, out) so kernels compute x @ W.
    limit = float(np.sqrt(6.0 / (fan_in + fan_out)))
    return jax.random.uniform(key, (fan_in, fan_out), jnp.float32, -limit, limit)


def init_params(seed=0):
    key = jax.random.PRNGKey(seed)
    keys = jax.random.split(key, 16)
    rel_w = jnp.stack(
        [_xavier_uniform(keys[4 + i], 3 * D, D) for i in range(NUM_RELATION_TYPES)],
        axis=0)
    return {
        "roberta_emb": jax.random.normal(keys[0], (VOCAB, D), jnp.float32) * 0.02,
        "W_proj1": _xavier_uniform(keys[1], D, P).astype(W_DTYPE),
        "b_proj1": jnp.zeros((1, P), jnp.float32),
        "W_proj2": _xavier_uniform(keys[2], P, P).astype(W_DTYPE),
        "b_proj2": jnp.zeros((1, P), jnp.float32),
        "W_text_tree": _xavier_uniform(keys[3], 2 * D, D).astype(W_DTYPE),
        "b_text_tree": jnp.zeros((1, D), jnp.float32),
        # stacked relation weights [10, 3D, D]; lives in HBM, sliced (or pinned) per call
        "W_rel_stack": rel_w.astype(W_DTYPE),
        "b_rel_stack": jnp.zeros((NUM_RELATION_TYPES, 1, D), jnp.float32),
    }


# ----------------------------- forward pass ---------------------------------

def token_embedding(params, input_ids, attention_mask):
    # TODO(synk): pretrained FacebookAI/roberta-base transformer cannot be rebuilt
    # in-script; stand-in is a deterministic embedding-table lookup whose "sum of
    # the last 4 hidden layers" is emulated by 4 fixed per-layer scales.
    del attention_mask
    emb = params["roberta_emb"][input_ids]                  # (N, S, D)
    layer_scales = jnp.asarray([1.0, 0.5, 0.25, 0.125], jnp.float32)
    return emb * jnp.sum(layer_scales)


def batched_sequence_embedding(params, groups):
    """Pool several (ids, mask) groups with ONE Pallas call; returns list of (n_i, D)."""
    max_s = max(int(ids.shape[1]) for ids, _ in groups)
    embs, masks, sizes = [], [], []
    for ids, mask in groups:
        tok = token_embedding(params, ids, mask)            # (n, s, D)
        m = mask.astype(jnp.float32)
        pad = max_s - tok.shape[1]
        if pad:
            tok = jnp.pad(tok, ((0, 0), (0, pad), (0, 0)))
            m = jnp.pad(m, ((0, 0), (0, pad)))
        embs.append(tok)
        masks.append(m)
        sizes.append(tok.shape[0])
    pooled = pallas_masked_mean_pool(jnp.concatenate(embs, axis=0),
                                     jnp.concatenate(masks, axis=0))
    out, off = [], 0
    for nrows in sizes:
        out.append(pooled[off:off + nrows])
        off += nrows
    return out


def tree_embedding_forward(
    params,
    logical_keyword_input_ids, logical_keyword_attention_mask,
    left_argument_input_ids, left_argument_attention_mask,
    right_argument_input_ids, right_argument_attention_mask,
    sentence_text_input_ids, sentence_text_attention_mask,
    num_logical_relations_each_sent, index_logical_relation,
):
    num_rel = np.asarray(num_logical_relations_each_sent, dtype=np.int64)
    rel_idx = np.asarray(index_logical_relation, dtype=np.int64)

    num_sents = int(sentence_text_input_ids.shape[0])
    have_rel = int(logical_keyword_input_ids.shape[0]) != 0

    if num_sents == 0:
        # tree stays zeros, no divide; emulate with zero row weights.
        sent_emb = jnp.zeros((1, D), jnp.float32)
        sub_emb = jnp.zeros((1, D), jnp.float32)
        wtt_rows = np.zeros((1, 1), np.float32)
        wplain_rows = np.zeros((1, 1), np.float32)
    else:
        if have_rel:
            sent_emb, kw_emb, la_emb, ra_emb = batched_sequence_embedding(
                params,
                [(sentence_text_input_ids, sentence_text_attention_mask),
                 (logical_keyword_input_ids, logical_keyword_attention_mask),
                 (left_argument_input_ids, left_argument_attention_mask),
                 (right_argument_input_ids, right_argument_attention_mask)])
        else:
            (sent_emb,) = batched_sequence_embedding(
                params, [(sentence_text_input_ids, sentence_text_attention_mask)])

        R = int(num_rel.sum()) if have_rel else 0
        if R > 0:
            # Per-relation metadata (host-resident, mirrors the torch .item() loop).
            counts = num_rel.astype(np.int64)
            out_row = np.repeat(np.arange(num_sents, dtype=np.int32), counts)
            seg_starts = np.concatenate([[0], np.cumsum(counts)[:-1]])
            is_first = np.zeros((R,), np.int32)
            for s_i in range(num_sents):
                if counts[s_i] > 0:
                    is_first[int(seg_starts[s_i])] = 1
            rel0 = (rel_idx[:R] - 1).astype(np.int32)       # 1-based -> 0-based
            sub_emb = pallas_subtree_chain_batched(
                params, la_emb[:R], kw_emb[:R], ra_emb[:R],
                rel0, is_first, out_row, num_sents)
            has_rel_mask = (num_rel > 0).astype(np.float32)
        else:
            sub_emb = jnp.zeros((num_sents, D), jnp.float32)
            has_rel_mask = np.zeros((num_sents,), np.float32)

        inv_n = 1.0 / float(num_sents)
        wtt_rows = (has_rel_mask * inv_n).reshape(num_sents, 1).astype(np.float32)
        wplain_rows = ((1.0 - has_rel_mask) * inv_n).reshape(num_sents, 1).astype(np.float32)

    # W_text_tree rows + masked sentence sum + /num_sents + proj2(proj1(.)) fused.
    return pallas_fused_epilogue(
        params, sent_emb, sub_emb,
        jnp.asarray(wtt_rows, jnp.float32), jnp.asarray(wplain_rows, jnp.float32))


# ----------------------------- pure-JAX f32 reference -----------------------

def reference_forward(params,
                      kw_ids, kw_mask, la_ids, la_mask, ra_ids, ra_mask,
                      st_ids, st_mask, num_rel_each_sent, index_logical_relation):
    """f32 reference mirroring the torch forward (same bf16-stored weight values
    upcast to f32); bounds the bf16-activation / approx-reciprocal error."""
    wtt = params["W_text_tree"].astype(jnp.float32); btt = params["b_text_tree"]
    wrel = params["W_rel_stack"].astype(jnp.float32); brel = params["b_rel_stack"]
    w1 = params["W_proj1"].astype(jnp.float32); b1 = params["b_proj1"]
    w2 = params["W_proj2"].astype(jnp.float32); b2 = params["b_proj2"]

    def pool(ids, mask):
        emb = token_embedding(params, ids, mask)
        m = mask.astype(jnp.float32)
        return jnp.sum(emb * m[:, :, None], axis=1) / jnp.sum(m, axis=1, keepdims=True)

    num_rel = np.asarray(num_rel_each_sent, np.int64)
    rel_idx = np.asarray(index_logical_relation, np.int64)
    tree = jnp.zeros((1, D), jnp.float32)
    if st_ids.shape[0] != 0:
        sent = pool(st_ids, st_mask)
        ns = sent.shape[0]
        if kw_ids.shape[0] != 0:
            kwv, lav, rav = pool(kw_ids, kw_mask), pool(la_ids, la_mask), pool(ra_ids, ra_mask)
            for i in range(ns):
                n_i = int(num_rel[i])
                start = int(num_rel[:i].sum())
                if n_i != 0:
                    sub = None
                    for j in range(start, start + n_i):
                        r = int(rel_idx[j]) - 1
                        if sub is None:
                            rhs = rav[j:j + 1]
                        else:
                            rhs = jnp.concatenate([rav[j:j + 1], sub], axis=1) @ wtt + btt
                        sub = (jnp.concatenate([lav[j:j + 1], kwv[j:j + 1], rhs], axis=1)
                               @ wrel[r] + brel[r])
                    tree = tree + (jnp.concatenate([sent[i:i + 1], sub], axis=1) @ wtt + btt)
                else:
                    tree = tree + sent[i:i + 1]
        else:
            tree = tree + jnp.sum(sent, axis=0, keepdims=True)
        tree = tree / ns
    return (tree @ w1 + b1) @ w2 + b2


# ----------------------------- driver ----------------------------------------

if __name__ == "__main__":
    params = init_params(seed=0)

    key = jax.random.PRNGKey(0)
    k_ids = jax.random.split(key, 8)

    NUM_SENTS, SENT_LEN = 3, 16     # sentence text sequences
    NUM_REL, ARG_LEN = 3, 8         # total logical relations across sentences

    def make_ids_mask(k, n, s):
        ids = jax.random.randint(k, (n, s), 0, VOCAB, dtype=jnp.int32)
        # deterministic lengths so every row has >=1 non-padding token
        lens = (jnp.arange(n) % (s - 2)) + 2
        mask = (jnp.arange(s)[None, :] < lens[:, None]).astype(jnp.int32)
        return ids, mask

    st_ids, st_mask = make_ids_mask(k_ids[0], NUM_SENTS, SENT_LEN)
    kw_ids, kw_mask = make_ids_mask(k_ids[1], NUM_REL, ARG_LEN)
    la_ids, la_mask = make_ids_mask(k_ids[2], NUM_REL, ARG_LEN)
    ra_ids, ra_mask = make_ids_mask(k_ids[3], NUM_REL, ARG_LEN)

    num_logical_relations_each_sent = np.array([2, 0, 1], dtype=np.int64)
    index_logical_relation = np.array([1, 5, 10], dtype=np.int64)

    out = tree_embedding_forward(
        params,
        kw_ids, kw_mask,
        la_ids, la_mask,
        ra_ids, ra_mask,
        st_ids, st_mask,
        num_logical_relations_each_sent, index_logical_relation,
    )
    out = jax.block_until_ready(out)
    assert out.shape == (1, P) and out.dtype == jnp.float32
    assert bool(jnp.all(jnp.isfinite(out)))

    # tolerance check vs f32 reference (bf16 weights/activations, approx reciprocal)
    ref = np.asarray(jax.block_until_ready(reference_forward(
        params, kw_ids, kw_mask, la_ids, la_mask, ra_ids, ra_mask,
        st_ids, st_mask, num_logical_relations_each_sent, index_logical_relation)))
    out_np = np.asarray(out)
    rel_err = float(np.linalg.norm(out_np - ref) / max(np.linalg.norm(ref), 1e-6))
    assert rel_err < 5e-2, f"kernel vs f32 reference mismatch: rel L2 err={rel_err}"

    print("KERNEL_OK")
</pallas_src>

<mosaic_0001>
module attributes {stable_mosaic.version = 11 : i64} {
  func.func @_masked_mean_pool_kernel(%arg0: i32, %arg1: memref<8x16x768xf32, #tpu.memory_space<vmem>>, %arg2: memref<8x16x1xf32, #tpu.memory_space<vmem>>, %arg3: memref<8x768xf32, #tpu.memory_space<vmem>>) attributes {dimension_semantics = [#tpu.dimension_semantics<parallel>], iteration_bounds = array<i64: 2>, scalar_prefetch = 0 : i64, scratch_operands = 0 : i64, tpu.core_type = #tpu.core_type<tc>, window_params = [{transform_indices = @transform_0, window_bounds = array<i64: 8, 16, 768>}, {transform_indices = @transform_1, window_bounds = array<i64: 8, 16, 1>}, {transform_indices = @transform_2, window_bounds = array<i64: 8, 768>}]} {
    %c0 = arith.constant 0 : index
    %c0_0 = arith.constant 0 : index
    %c0_1 = arith.constant 0 : index
    %0 = vector.load %arg1[%c0, %c0_0, %c0_1] : memref<8x16x768xf32, #tpu.memory_space<vmem>>, vector<8x16x768xf32>
    %c0_2 = arith.constant 0 : index
    %c0_3 = arith.constant 0 : index
    %c0_4 = arith.constant 0 : index
    %1 = vector.load %arg2[%c0_2, %c0_3, %c0_4] : memref<8x16x1xf32, #tpu.memory_space<vmem>>, vector<8x16x1xf32>
    %2 = vector.broadcast %1 : vector<8x16x1xf32> to vector<8x16x768xf32>
    %3 = arith.mulf %0, %2 : vector<8x16x768xf32>
    %cst = arith.constant dense<0.000000e+00> : vector<8x768xf32>
    %4 = vector.multi_reduction <add>, %3, %cst [1] : vector<8x16x768xf32> to vector<8x768xf32>
    %cst_5 = arith.constant dense<0.000000e+00> : vector<8x1xf32>
    %5 = vector.multi_reduction <add>, %1, %cst_5 [1] : vector<8x16x1xf32> to vector<8x1xf32>
    %cst_6 = arith.constant 1.000000e+00 : f32
    %6 = vector.broadcast %cst_6 : f32 to vector<8x1xf32>
    %7 = arith.maximumf %5, %6 : vector<8x1xf32>
    %8 = tpu.reciprocal %7 {approx = true} : vector<8x1xf32> -> vector<8x1xf32>
    %9 = vector.broadcast %8 : vector<8x1xf32> to vector<8x768xf32>
    %10 = arith.mulf %4, %9 : vector<8x768xf32>
    %c0_7 = arith.constant 0 : index
    %c0_8 = arith.constant 0 : index
    %11 = vector.load %arg3[%c0_7, %c0_8] : memref<8x768xf32, #tpu.memory_space<vmem>>, vector<8x768xf32>
    tpu.vector_store %arg3[%c0_7, %c0_8], %10 {strides = array<i32>} : memref<8x768xf32, #tpu.memory_space<vmem>>, vector<8x768xf32>,
    return
  }
  func.func @transform_0(%arg0: i32) -> (i32, i32, i32) {
    %c0_i32 = arith.constant 0 : i32
    %c0_i32_0 = arith.constant 0 : i32
    %c0_i32_1 = arith.constant 0 : i32
    return %arg0, %c0_i32, %c0_i32_0 : i32, i32, i32
  }
  func.func @transform_1(%arg0: i32) -> (i32, i32, i32) {
    %c0_i32 = arith.constant 0 : i32
    %c0_i32_0 = arith.constant 0 : i32
    %c0_i32_1 = arith.constant 0 : i32
    return %arg0, %c0_i32, %c0_i32_0 : i32, i32, i32
  }
  func.func @transform_2(%arg0: i32) -> (i32, i32) {
    %c0_i32 = arith.constant 0 : i32
    %c0_i32_0 = arith.constant 0 : i32
    return %arg0, %c0_i32 : i32, i32
  }
}

</mosaic_0001>

<bundles_post_ra>
// kernel: tpu_custom_call.1
= control target key start
LH: loop header
LB: loop body
LE: loop exit
PB: predicated region body
PF: predicated region fallthrough
CT: control target
= control target key end

     0   :  { %7 = vsyncpa [#allocation3], 0  ;;  %s2071_s0 = inlined_call_operand.hbm [shape: f32[16,16,768], index: 0, kind: input, shape index: {}]   ;;  %s2072_s1 = inlined_call_operand.vmem [shape: f32[16,16,1], index: 1, kind: input, shape index: {}]   ;;  %s2073_s2 = inlined_call_operand.hbm [shape: f32[16,768], index: 2, kind: output, shape index: {}]  }
   0x1   :  { %9 = vsyncpa [#allocation3 + $0x1], 0 }
   0x2   :  { %10 = vsyncpa [#allocation4], 0 }
   0x3   :  { %12 = vsyncpa [#allocation4 + $0x1], 0  ;;  %s1400_s9 = smov 0   ;;  %s1402_s10 = smov 0  }
   0x4   :  { %s1404_s11 = smov 0   ;;  %s1406_s12 = smov 0  }
   0x5 LB: > { %s1421_s13 = sadd.s32 4294967295, %s1378_s12   ;;  %s1196_s14 = sadd.s32 4294967294, %s1378_s12   ;;  %s1378_s12 = sphi %s1406_s12, %s2123_s12   ;;  %s1374_s11 = sphi %s1404_s11, %s2122_s11   ;;  %s1370_s10 = sphi %s1402_s10, %s2121_s10   ;;  %s1366_s9 = sphi %s1400_s9, %s2120_s9  }
   0x6   : > { %s1425_s15 = sadd.s32 1, %s1378_s12   ;;  %s25_s16 = sadd.s32 1, %s1374_s11 }
   0x7   : > { %s22_s17 = ssub.s32 %s1378_s12, %s1425_s15  ;;  %p32_p0 = scmp.ne.s32.totalorder %s1374_s11, %s1370_s10 }
   0x8   : > { %p23_p1 = scmp.eq.s32.totalorder %s22_s17, 0  ;;  %p33_p2 = scmp.eq.s32.totalorder %s1378_s12, 0 }
   0x9   : > { %p38_p3 = scmp.ne.s32.totalorder %s1370_s10, %s1366_s9  ;;  %p39_p4 = scmp.eq.s32.totalorder %s1421_s13, 0 }
   0xa   : > { %s1437_s18 = scalar_select %p23_p1, %s1374_s11, %s25_s16  }
   0xb   : > { %p34_p5 = por %p33_p2, %p32_p0  ;;  %p1439_p6 = por %p39_p4, %p38_p3 }
   0xc   : > { %p88_p7 = scmp.eq.s32.totalorder %s1421_s13, 1  ;;  %p94_p8 = scmp.eq.s32.totalorder %s1196_s14, 1 }
   0xd   : > { %p1227_p10 = scmp.lt.s32.totalorder %s1378_s12, 2  ;;  %s114_s22 = sand.u32 1, %s1374_s11  }
   0xe   : > { %p1446_p11 = por %p88_p7, %p32_p0  ;;  %p1450_p12 = por %p94_p8, %p38_p3 }
   0xf   : > { %s1211_s23 = smul.u32 12288, %s1378_s12  ;;  %p1461_p13 = pnand %p1227_p10, %p34_p5 }
  0x10   : > { %s2086_s20 = scalar_select %p1446_p11, 1, 0 }
  0x11   : > { %s2087_s21 = scalar_select %p1450_p12, 1, 0 }
  0x12   : > { %s1210_s24 = smul.u32 768, %s114_s22  ;;  %s1459_s27 = scalar_lea.hbm %s2071_s0, %s1211_s23 }
  0x13   : > { %s1467_s3 = scalar_lea.sflag [#allocation3], %s114_s22  ;;  %s1282_s4 = scalar_lea.hbm %s1459_s27, 12288 }
  0x14   : > { %s118_s29 = scalar_lea.vmem [#allocation2], %s1210_s24  ;;  %p1283_p0 = scmp.ne.s32.totalorder %s1459_s27, %s1282_s4 }
  0x15   : > { %s126_s30 = sshll.u32 %s118_s29, 4  ;;  %p1284_p1 = pneg %p1461_p13  ;;  %s1465_s30 = int_to_ptr.vmem [resolvable:$true] %s126_s30 }
  0x16   : > { %s1287_s7 = scalar_lea.hbm %s2071_s0, 24576  ;;  %p1288_p4 = scmp.lt.u32.totalorder %s1459_s27, %s2071_s0 }
  0x17   : > { %p1285_p2 = pnand %p1284_p1, %p1283_p0  ;;  %p1289_p5 = scmp.lt.u32.totalorder %s1287_s7, %s1282_s4 }
  0x18   : > { %p1291_p8 = scmp.lt.u32.totalorder %s1282_s4, %s1459_s27 }
  0x19   : > { %p1286_p3 = pneg %p1285_p2  ;;  %p1290_p7 = por %p1289_p5, %p1288_p4 }
  0x1b   : > { %p1292_p10 = por %p1291_p8, %p1290_p7 }
  0x1d   : > { %p1293_p9 = pnand %p1292_p10, %p1286_p3 }
  0x1f   : > { %1296 = shalt.err (!%p1293_p9)
}
  0x20   : > { %s1297_s16 = scalar_lea.vmem %s1465_s30, 12288  ;;  %s1380_s17 = smov [#allocation2]  }
  0x21   : > { %p1298_p0 = scmp.ne.s32.totalorder %s1465_s30, %s1297_s16  ;;  %s1302_s22 = sshll.u32 %s1380_s17, 4  ;;  %s1303_s22 = int_to_ptr.vmem [resolvable:$false] %s1302_s22 }
  0x22   : > { %s1304_s23 = scalar_lea.vmem %s1303_s22, 24576  ;;  %p1305_p11 = scmp.lt.s32.totalorder %s1465_s30, %s1303_s22 }
  0x23   : > { %p1300_p2 = pnand %p1298_p0, %p1284_p1  ;;  %p1306_p4 = scmp.lt.s32.totalorder %s1304_s23, %s1297_s16 }
  0x25   : > { %p1301_p12 = pneg %p1300_p2  ;;  %p1307_p5 = por %p1306_p4, %p1305_p11 }
  0x27   : > { %p1308_p7 = pnand %p1307_p5, %p1301_p12 }
  0x29   : > { %1311 = shalt.err (!%p1308_p7)
}
  0x2a   : > { %s1381_s24 = smov 768   ;;  %s1382_s25 = smov 48  }
  0x2b   : > { %1222 = dma.hbm_to_vmem [thread:$0]  (!%p1461_p13), %s1459_s27, 12288, %s1465_s30, %s1467_s3, %s1381_s24, %s1381_s24, %s1382_s25  }
  0x2c   : > { %p1202_p9 = scmp.ge.s32.totalorder %s1378_s12, 1  ;;  %p144_p1 = scmp.lt.s32.totalorder %s1378_s12, 3 }
  0x2e   : > { %p145_p3 = pnand %p1202_p9, %p144_p1 }
  0x30   : > { %148 = sbr.rel (%p145_p3) target bundleno = 342 (0x156), region = 28 }
  0x37   : > { %s1498_s26 = sand.u32 1, %s1370_s10  }
  0x38   : > { %s1212_s29 = smul.u32 768, %s1498_s26  ;;  %s151_s4 = scalar_lea.sflag [#allocation3], %s1498_s26 }
  0x3a   : > { %s1502_s5 = scalar_lea.vmem [#allocation2], %s1212_s29 }
  0x3b   : > { %1357 = dma.done.wait (%p1439_p6), %s151_s4, 12288  }
  0x3c   : > { %1359 = vsyncadd (%p1439_p6), %s151_s4, 4294955008  ;;  %s1203_s27 = sshll.u32 %s1421_s13, 3  ;;  %v1383_v0 = vmov 0   ;;  %vm813_vm0 = vcmask 7168   ;;  %vm1038_vm1 = vcmask 1041409   ;;  %vm1040_vm2 = vcmask 1042434  }
  0x3d   : > { %1265 = vset.pattern.permute.xlu1 %v1383_v0  ;;  %1264 = vset.pattern.permute.xlu0 %v1383_v0  ;;  %p183_p11 = scmp.lt.s32.totalorder %s1203_s27, 15  ;;  %vm1042_vm3 = vcmask 1043459   ;;  %vm1044_vm4 = vcmask 1044484   ;;  %vm1046_vm5 = vcmask 1045509   ;;  %vm1048_vm6 = vcmask 1046534   ;;  %s1213_s19 = smul.u32 48, %s1498_s26 }
  0x3e   : > { %vm1050_vm7 = vcmask 1047559   ;;  %s1214_s8 = smul.u32 768, %s1421_s13  ;;  %s1100_s22 = scalar_lea.sflag [#allocation4], %s1498_s26 }
  0x3f   : > { %s2125_s27 = smov (!%p183_p11, %s1203_s27), 15  ;;  %s180_s7 = scalar_lea.vmem [#allocation5], %s1213_s19 }
  0x40   : > { %s1209_s28 = sshll.u32 %s2125_s27, 4  ;;  %s1114_s14 = sshll.u32 %s180_s7, 4  ;;  %s2027_s14 = int_to_ptr.vmem [resolvable:$true] %s1114_s14 }
  0x41   : > { %s1512_s6 = scalar_lea.vmem %s2072_s1, %s1209_s28  ;;  %s2025_s17 = scalar_lea.hbm %s2073_s2, %s1214_s8 }
  0x42   : > { %v287_v1 = vld [vmem:[%s1512_s6 + $0x10] sm:$0xff]  ;;  %v285_v2 = vld [vmem:[%s1512_s6] sm:$0xff]  ;;  %v288_v3 = vld [vmem:[%s1512_s6 + $0x18] sm:$0xff]  ;;  %s1312_s23 = scalar_lea.vmem %s2027_s14, 768  ;;  %p2117_p12 = scmp.ne.s32.totalorder %s2086_s20, 0 }
  0x43   : > { %313 = vperm.xlu1 %1265, %v287_v1   ;;  %v823_v4 = vsel %vm813_vm0, %v287_v1, 0.0  ;;  %303 = vperm.xlu0 %1264, %v285_v2   ;;  %v814_v5 = vsel %vm813_vm0, %v285_v2, 0.0  ;;  %v824_v6 = vsel %vm813_vm0, %v288_v3, 0.0  ;;  %v286_v7 = vld [vmem:[%s1512_s6 + $0x8] sm:$0xff]  ;;  %v289_v9 = vld [vmem:[%s1512_s6 + $0x20] sm:$0xff]  ;;  %v292_v14 = vld [vmem:[%s1512_s6 + $0x38] sm:$0xff]  ;;  %p1313_p6 = scmp.ne.s32.totalorder %s2027_s14, %s1312_s23 }
  0x44   : > { %v290_v8 = vld [vmem:[%s1512_s6 + $0x28] sm:$0xff]  ;;  %v825_v10 = vadd.f32 %v824_v6, %v823_v4  ;;  %v815_v11 = vsel %vm813_vm0, %v286_v7, 0.0  ;;  %v832_v13 = vsel %vm813_vm0, %v289_v9, 0.0  ;;  %v291_v15 = vld [vmem:[%s1512_s6 + $0x30] sm:$0xff]  ;;  %v842_v19 = vsel %vm813_vm0, %v292_v14, 0.0  ;;  %v1534_v21 = vld [vmem:[%s1512_s6 + $0x40] sm:$0xff] }
  0x45   : > { %v833_v12 = vsel %vm813_vm0, %v290_v8, 0.0  ;;  %v1529_v16 = vld [vmem:[%s1512_s6 + $0x48] sm:$0xff]  ;;  %v816_v17 = vadd.f32 %v815_v11, %v814_v5  ;;  %v841_v20 = vsel %vm813_vm0, %v291_v15, 0.0  ;;  %v1537_v22 = vld [vmem:[%s1512_s6 + $0x58] sm:$0xff]  ;;  %v1540_v23 = vld [vmem:[%s1512_s6 + $0x50] sm:$0xff]  ;;  %v850_v27 = vsel %vm813_vm0, %v1534_v21, 0.0  ;;  %p1314_p13 = pnand %p1313_p6, %p2117_p12 }
  0x46   : > { %v834_v18 = vadd.f32 %v833_v12, %v832_v13  ;;  %v826_v24 = vrot.slane %v825_v10, 4  ;;  %v843_v25 = vadd.f32 %v842_v19, %v841_v20  ;;  %v851_v26 = vsel %vm813_vm0, %v1529_v16, 0.0  ;;  %v1547_v28 = vld [vmem:[%s1512_s6 + $0x68] sm:$0xff]  ;;  %v1552_v33 = vld [vmem:[%s1512_s6 + $0x60] sm:$0xff]  ;;  %v1555_v34 = vld [vmem:[%s1512_s6 + $0x78] sm:$0xff]  ;;  %s1384_s24 = smov [#allocation5]  }
  0x47   : > { %318 = vperm.xlu1 %1265, %v288_v3   ;;  %308 = vperm.xlu0 %1264, %v286_v7   ;;  %v817_v29 = vrot.slane %v816_v17, 4  ;;  %v852_v31 = vadd.f32 %v851_v26, %v850_v27  ;;  %v860_v32 = vsel %vm813_vm0, %v1537_v22, 0.0  ;;  %v859_v37 = vsel %vm813_vm0, %v1540_v23, 0.0  ;;  %v1562_v43 = vld [vmem:[%s1512_s6 + $0x70] sm:$0xff]  ;;  %p1315_p8 = pneg %p1314_p13  ;;  %s1316_s25 = sshll.u32 %s1384_s24, 4  ;;  %s1317_s25 = int_to_ptr.vmem [resolvable:$false] %s1316_s25 }
  0x48   : > { %v835_v30 = vrot.slane %v834_v18, 4  ;;  %v827_v35 = vadd.f32 %v826_v24, %v825_v10  ;;  %v844_v36 = vrot.slane %v843_v25, 4  ;;  %v869_v38 = vsel %vm813_vm0, %v1547_v28, 0.0  ;;  %s1318_s29 = scalar_lea.vmem %s1317_s25, 1536  ;;  %p1319_p10 = scmp.lt.s32.totalorder %s2027_s14, %s1317_s25 }
  0x49   : > { %v818_v39 = vadd.f32 %v817_v29, %v816_v17  ;;  %v853_v41 = vrot.slane %v852_v31, 4  ;;  %v861_v42 = vadd.f32 %v860_v32, %v859_v37  ;;  %v868_v46 = vsel %vm813_vm0, %v1552_v33, 0.0  ;;  %p1320_p0 = scmp.lt.s32.totalorder %s1318_s29, %s1312_s23 }
  0x4a   : > { %v836_v40 = vadd.f32 %v835_v30, %v834_v18  ;;  %v828_v44 = vrot.slane %v827_v35, 2  ;;  %v845_v45 = vadd.f32 %v844_v36, %v843_v25  ;;  %v878_v47 = vsel %vm813_vm0, %v1555_v34, 0.0 }
  0x4b   : > { %v819_v48 = vrot.slane %v818_v39, 2  ;;  %328 = vperm.xlu1 %1265, %v290_v8   ;;  %323 = vperm.xlu0 %1264, %v289_v9   ;;  %v854_v50 = vadd.f32 %v853_v41, %v852_v31  ;;  %v862_v51 = vrot.slane %v861_v42, 4  ;;  %v870_v54 = vadd.f32 %v869_v38, %v868_v46  ;;  %v201_v41 = vld [vmem:[%s1502_s5 + $0x60] sm:$0xff]  ;;  %p1321_p2 = por %p1320_p0, %p1319_p10 }
  0x4c   : > { %v837_v49 = vrot.slane %v836_v40, 2  ;;  %v829_v52 = vadd.f32 %v828_v44, %v827_v35  ;;  %v846_v53 = vrot.slane %v845_v45, 2  ;;  %v877_v55 = vsel %vm813_vm0, %v1562_v43, 0.0  ;;  %v203_v44 = vld [vmem:[%s1502_s5 + $0x70] sm:$0xff]  ;;  %v205_v46 = vld [vmem:[%s1502_s5 + $0x80] sm:$0xff] }
  0x4d   : > { %v820_v56 = vadd.f32 %v819_v48, %v818_v39  ;;  %v855_v58 = vrot.slane %v854_v50, 2  ;;  %v863_v59 = vadd.f32 %v862_v51, %v861_v42  ;;  %v871_v62 = vrot.slane %v870_v54, 4  ;;  %v202_v42 = vld [vmem:[%s1502_s5 + $0x68] sm:$0xff]  ;;  %v208_v51 = vld [vmem:[%s1502_s5 + $0x98] sm:$0xff]  ;;  %p1322_p4 = pnand %p1321_p2, %p1315_p8 }
  0x4e   : > { %v838_v57 = vadd.f32 %v837_v49, %v836_v40  ;;  %v830_v60 = vrot.slane %v829_v52, 1  ;;  %v847_v61 = vadd.f32 %v846_v53, %v845_v45  ;;  %v879_v63 = vadd.f32 %v878_v47, %v877_v55  ;;  %v204_v45 = vld [vmem:[%s1502_s5 + $0x78] sm:$0xff]  ;;  %v206_v48 = vld [vmem:[%s1502_s5 + $0x88] sm:$0xff]  ;;  %v189_v49 = vld [vmem:[%s1502_s5] sm:$0xff] }
  0x4f   : > { %v821_v0 = vrot.slane %v820_v56, 1  ;;  %338 = vperm.xlu1 %1265, %v292_v14   ;;  %333 = vperm.xlu0 %1264, %v291_v15   ;;  %v856_v2 = vadd.f32 %v855_v58, %v854_v50  ;;  %v864_v3 = vrot.slane %v863_v59, 2  ;;  %v872_v6 = vadd.f32 %v871_v62, %v870_v54  ;;  %v207_v50 = vld [vmem:[%s1502_s5 + $0x90] sm:$0xff]  ;;  %v210_v53 = vld [vmem:[%s1502_s5 + $0xa8] sm:$0xff]  ;;  %v212_v58 = vld [vmem:[%s1502_s5 + $0xb8] sm:$0xff] }
  0x50   : > { %v839_v1 = vrot.slane %v838_v57, 1  ;;  %v831_v4 = vadd.f32 %v830_v60, %v829_v52  ;;  %v848_v5 = vrot.slane %v847_v61, 1  ;;  %v880_v7 = vrot.slane %v879_v63, 4  ;;  %v209_v52 = vld [vmem:[%s1502_s5 + $0xa0] sm:$0xff] }
  0x51   : > { %v822_v8 = vadd.f32 %v821_v0, %v820_v56  ;;  %v857_v10 = vrot.slane %v856_v2, 1  ;;  %v865_v11 = vadd.f32 %v864_v3, %v863_v59  ;;  %v873_v17 = vrot.slane %v872_v6, 2  ;;  %v190_v56 = vld [vmem:[%s1502_s5 + $0x8] sm:$0xff] }
  0x52   : > { %v840_v9 = vadd.f32 %v839_v1, %v838_v57  ;;  %v887_v12 = vmax.f32 %v831_v4, 1.0  ;;  %v849_v13 = vadd.f32 %v848_v5, %v847_v61  ;;  %v881_v18 = vadd.f32 %v880_v7, %v879_v63  ;;  %v211_v57 = vld [vmem:[%s1502_s5 + $0xb0] sm:$0xff]  ;;  %v192_v1 = vld [vmem:[%s1502_s5 + $0x18] sm:$0xff] }
  0x53   : > { %v886_v19 = vmax.f32 %v822_v8, 1.0  ;;  %348 = vperm.xlu1 %1265, %v1529_v16   ;;  %343 = vperm.xlu0 %1264, %v1534_v21   ;;  %v866_v14 = vrot.slane %v865_v11, 1  ;;  %v874_v15 = vadd.f32 %v873_v17, %v872_v6  ;;  %v858_v26 = vadd.f32 %v857_v10, %v856_v2  ;;  %v191_v63 = vld [vmem:[%s1502_s5 + $0x10] sm:$0xff]  ;;  %v196_v8 = vld [vmem:[%s1502_s5 + $0x38] sm:$0xff]  ;;  %v198_v17 = vld [vmem:[%s1502_s5 + $0x48] sm:$0xff] }
  0x54   : > { %v882_v20 = vrot.slane %v881_v18, 2  ;;  %1266 = vrcp.f32 %v887_v12  ;;  %v888_v24 = vmax.f32 %v840_v9, 1.0  ;;  %v889_v25 = vmax.f32 %v849_v13, 1.0  ;;  %v195_v7 = vld [vmem:[%s1502_s5 + $0x30] sm:$0xff]  ;;  %v197_v13 = vld [vmem:[%s1502_s5 + $0x40] sm:$0xff] }
  0x55   : > { %1268 = vrcp.f32 %v886_v19  ;;  %v867_v27 = vadd.f32 %v866_v14, %v865_v11  ;;  %v875_v29 = vrot.slane %v874_v15, 1  ;;  %v890_v16 = vmax.f32 %v858_v26, 1.0  ;;  %v194_v26 = vld [vmem:[%s1502_s5 + $0x28] sm:$0xff] }
  0x56   : > { %v883_v30 = vadd.f32 %v882_v20, %v881_v18  ;;  %1270 = vrcp.f32 %v888_v24  ;;  %v199_v20 = vld [vmem:[%s1502_s5 + $0x50] sm:$0xff]  ;;  %v200_v24 = vld [vmem:[%s1502_s5 + $0x58] sm:$0xff] }
  0x57   : > { %358 = vperm.xlu1 %1265, %v1537_v22   ;;  %353 = vperm.xlu0 %1264, %v1540_v23   ;;  %v876_v32 = vadd.f32 %v875_v29, %v874_v15  ;;  %1272 = vrcp.f32 %v889_v25  ;;  %v891_v21 = vmax.f32 %v867_v27, 1.0  ;;  %v193_v25 = vld [vmem:[%s1502_s5 + $0x20] sm:$0xff] }
  0x58   : > { %v884_v31 = vrot.slane %v883_v30, 1  ;;  %1274 = vrcp.f32 %v890_v16 }
  0x59   : > { %v892_v36 = vmax.f32 %v876_v32, 1.0  ;;  %1276 = vrcp.f32 %v891_v21 }
  0x5a   : > { %v885_v35 = vadd.f32 %v884_v31, %v883_v30 }
  0x5b   : > { %368 = vperm.xlu1 %1265, %v1547_v28   ;;  %363 = vperm.xlu0 %1264, %v1552_v33   ;;  %1278 = vrcp.f32 %v892_v36 }
  0x5c   : > { %v893_v37 = vmax.f32 %v885_v35, 1.0 }
  0x5e   : > { %v1267_v38 = vpop.eup %1266  ;;  %1280 = vrcp.f32 %v893_v37 }
  0x5f   : > { %378 = vperm.xlu1 %1265, %v1555_v34   ;;  %373 = vperm.xlu0 %1264, %v1562_v43   ;;  %v1269_v22 = vpop.eup %1268 }
  0x60   : > { %v1271_v23 = vpop.eup %1270 }
  0x61   : > { %v1273_v28 = vpop.eup %1272 }
  0x62   : > { %v1275_v33 = vpop.eup %1274 }
  0x63   : > { %909 = vperm.xlu1 %1265, %v1267_v38   ;;  %904 = vperm.xlu0 %1264, %v1269_v22   ;;  %v1277_v34 = vpop.eup %1276 }
  0x65   : > { %v1279_v39 = vpop.eup %1278 }
  0x67   : > { %919 = vperm.xlu1 %1265, %v1273_v28   ;;  %914 = vperm.xlu0 %1264, %v1271_v23  }
  0x68   : > { %v1281_v40 = vpop.eup %1280 }
  0x6b   : > { %929 = vperm.xlu1 %1265, %v1277_v34   ;;  %924 = vperm.xlu0 %1264, %v1275_v33  }
  0x6f   : > { %939 = vperm.xlu1 %1265, %v1281_v40   ;;  %934 = vperm.xlu0 %1264, %v1279_v39  }
  0xc2   : > { %v314_v43 = vpop.permute.xlu1 %313  ;;  %v304_v47 = vpop.permute.xlu0 %303 }
  0xc3   : > { %v393_v54 = vmul.f32 %v314_v43, %v201_v41  ;;  %v394_v55 = vmul.f32 %v314_v43, %v202_v42  ;;  %v395_v59 = vmul.f32 %v314_v43, %v203_v44  ;;  %v396_v60 = vmul.f32 %v314_v43, %v204_v45 }
  0xc4   : > { %v397_v61 = vmul.f32 %v314_v43, %v205_v46  ;;  %v398_v62 = vmul.f32 %v314_v43, %v206_v48  ;;  %v381_v9 = vmul.f32 %v304_v47, %v189_v49  ;;  %v382_v10 = vmul.f32 %v304_v47, %v190_v56  ;;  %v219_v46 = vld [vmem:[%s1502_s5 + $0xf0] sm:$0xff]  ;;  %v220_v48 = vld [vmem:[%s1502_s5 + $0xf8] sm:$0xff]  ;;  %v221_v49 = vld [vmem:[%s1502_s5 + $0x100] sm:$0xff] }
  0xc5   : > { %v383_v27 = vmul.f32 %v304_v47, %v191_v63  ;;  %v384_v29 = vmul.f32 %v304_v47, %v192_v1  ;;  %v385_v23 = vmul.f32 %v304_v47, %v193_v25  ;;  %v386_v28 = vmul.f32 %v304_v47, %v194_v26  ;;  %v215_v63 = vld [vmem:[%s1502_s5 + $0xd0] sm:$0xff] }
  0xc6   : > { %v319_v0 = vpop.permute.xlu1 %318  ;;  %v309_v6 = vpop.permute.xlu0 %308 }
  0xc7   : > { %v399_v2 = vmul.f32 %v319_v0, %v207_v50  ;;  %v400_v3 = vmul.f32 %v319_v0, %v208_v51  ;;  %v401_v4 = vmul.f32 %v319_v0, %v209_v52  ;;  %v402_v5 = vmul.f32 %v319_v0, %v210_v53  ;;  %v222_v53 = vld [vmem:[%s1502_s5 + $0x108] sm:$0xff] }
  0xc8   : > { %v403_v11 = vmul.f32 %v319_v0, %v211_v57  ;;  %v404_v12 = vmul.f32 %v319_v0, %v212_v58  ;;  %v387_v30 = vmul.f32 %v309_v6, %v195_v7  ;;  %v388_v31 = vmul.f32 %v309_v6, %v196_v8 }
  0xc9   : > { %v519_v18 = vadd.f32 %v399_v2, %v393_v54  ;;  %v526_v19 = vadd.f32 %v400_v3, %v394_v55  ;;  %v533_v14 = vadd.f32 %v401_v4, %v395_v59  ;;  %v540_v15 = vadd.f32 %v402_v5, %v396_v60  ;;  %v223_v54 = vld [vmem:[%s1502_s5 + $0x110] sm:$0xff]  ;;  %v224_v55 = vld [vmem:[%s1502_s5 + $0x118] sm:$0xff]  ;;  %v217_v5 = vld [vmem:[%s1502_s5 + $0xe0] sm:$0xff] }
  0xca   : > { %v547_v16 = vadd.f32 %v403_v11, %v397_v61  ;;  %v554_v32 = vadd.f32 %v404_v12, %v398_v62  ;;  %v389_v21 = vmul.f32 %v309_v6, %v197_v13  ;;  %v390_v35 = vmul.f32 %v309_v6, %v198_v17  ;;  %v329_v45 = vpop.permute.xlu1 %328  ;;  %v324_v60 = vpop.permute.xlu0 %323  ;;  %v213_v61 = vld [vmem:[%s1502_s5 + $0xc0] sm:$0xff]  ;;  %v214_v62 = vld [vmem:[%s1502_s5 + $0xc8] sm:$0xff]  ;;  %v216_v4 = vld [vmem:[%s1502_s5 + $0xd8] sm:$0xff] }
  0xcb   : > { %v520_v36 = vrot.slane %v519_v18, 4  ;;  %v527_v37 = vrot.slane %v526_v19, 4  ;;  %v391_v38 = vmul.f32 %v309_v6, %v199_v20  ;;  %v392_v22 = vmul.f32 %v309_v6, %v200_v24  ;;  %v218_v6 = vld [vmem:[%s1502_s5 + $0xe8] sm:$0xff] }
  0xcc   : > { %v534_v33 = vrot.slane %v533_v14, 4  ;;  %v541_v34 = vrot.slane %v540_v15, 4  ;;  %v477_v39 = vadd.f32 %v387_v30, %v381_v9  ;;  %v484_v40 = vadd.f32 %v388_v31, %v382_v10  ;;  %v232_v30 = vld [vmem:[%s1502_s5 + $0x158] sm:$0xff] }
  0xcd   : > { %v491_v41 = vadd.f32 %v389_v21, %v383_v27  ;;  %v498_v42 = vadd.f32 %v390_v35, %v384_v29  ;;  %v505_v43 = vadd.f32 %v391_v38, %v385_v23  ;;  %v512_v44 = vadd.f32 %v392_v22, %v386_v28  ;;  %v231_v29 = vld [vmem:[%s1502_s5 + $0x150] sm:$0xff] }
  0xce   : > { %v1605_v50 = vadd.f32 %v520_v36, %v519_v18  ;;  %v1607_v47 = vadd.f32 %v527_v37, %v526_v19  ;;  %v548_v51 = vrot.slane %v547_v16, 4  ;;  %v555_v52 = vrot.slane %v554_v32, 4  ;;  %v339_v27 = vpop.permute.xlu1 %338  ;;  %v235_v28 = vld [vmem:[%s1502_s5 + $0x170] sm:$0xff] }
  0xcf   : > { %v1612_v56 = vadd.f32 %v534_v33, %v533_v14  ;;  %v1614_v57 = vadd.f32 %v541_v34, %v540_v15  ;;  %v478_v58 = vrot.slane %v477_v39, 4  ;;  %v485_v59 = vrot.slane %v484_v40, 4  ;;  %v236_v33 = vld [vmem:[%s1502_s5 + $0x178] sm:$0xff]  ;;  %v225_v34 = vld [vmem:[%s1502_s5 + $0x120] sm:$0xff] }
  0xd0   : > { %v492_v0 = vrot.slane %v491_v41, 4  ;;  %v499_v1 = vrot.slane %v498_v42, 4  ;;  %v411_v2 = vmul.f32 %v329_v45, %v219_v46  ;;  %v412_v3 = vmul.f32 %v329_v45, %v220_v48  ;;  %v334_v48 = vpop.permute.xlu0 %333 }
  0xd1   : > { %v506_v7 = vrot.slane %v505_v43, 4  ;;  %v513_v8 = vrot.slane %v512_v44, 4  ;;  %v413_v9 = vmul.f32 %v329_v45, %v221_v49  ;;  %v414_v10 = vmul.f32 %v329_v45, %v222_v53  ;;  %v227_v49 = vld [vmem:[%s1502_s5 + $0x130] sm:$0xff]  ;;  %v229_v53 = vld [vmem:[%s1502_s5 + $0x140] sm:$0xff] }
  0xd2   : > { %v415_v11 = vmul.f32 %v329_v45, %v223_v54  ;;  %v416_v12 = vmul.f32 %v329_v45, %v224_v55  ;;  %v405_v13 = vmul.f32 %v324_v60, %v213_v61  ;;  %v406_v17 = vmul.f32 %v324_v60, %v214_v62  ;;  %v230_v54 = vld [vmem:[%s1502_s5 + $0x148] sm:$0xff] }
  0xd3   : > { %v407_v18 = vmul.f32 %v324_v60, %v215_v63  ;;  %v408_v19 = vmul.f32 %v324_v60, %v216_v4  ;;  %v409_v14 = vmul.f32 %v324_v60, %v217_v5  ;;  %v410_v15 = vmul.f32 %v324_v60, %v218_v6  ;;  %v349_v5 = vpop.permute.xlu1 %348  ;;  %v243_v6 = vld [vmem:[%s1502_s5 + $0x1b0] sm:$0xff] }
  0xd4   : > { %v1622_v20 = vadd.f32 %v548_v51, %v547_v16  ;;  %v1624_v24 = vadd.f32 %v555_v52, %v554_v32  ;;  %v561_v25 = vadd.f32 %v411_v2, %v405_v13  ;;  %v568_v26 = vadd.f32 %v412_v3, %v406_v17  ;;  %v233_v16 = vld [vmem:[%s1502_s5 + $0x160] sm:$0xff]  ;;  %v234_v32 = vld [vmem:[%s1502_s5 + $0x168] sm:$0xff] }
  0xd5   : > { %v1628_v31 = vadd.f32 %v478_v58, %v477_v39  ;;  %v1630_v21 = vadd.f32 %v485_v59, %v484_v40  ;;  %v575_v35 = vadd.f32 %v413_v9, %v407_v18  ;;  %v582_v36 = vadd.f32 %v414_v10, %v408_v19  ;;  %v246_v13 = vld [vmem:[%s1502_s5 + $0x1c8] sm:$0xff] }
  0xd6   : > { %v1634_v37 = vadd.f32 %v492_v0, %v491_v41  ;;  %v1636_v38 = vadd.f32 %v499_v1, %v498_v42  ;;  %v1638_v22 = vadd.f32 %v506_v7, %v505_v43  ;;  %v1640_v23 = vadd.f32 %v513_v8, %v512_v44  ;;  %v226_v41 = vld [vmem:[%s1502_s5 + $0x128] sm:$0xff]  ;;  %v228_v42 = vld [vmem:[%s1502_s5 + $0x138] sm:$0xff] }
  0xd7   : > { %v1645_v39 = vadd.f32 %v415_v11, %v409_v14  ;;  %v1647_v40 = vadd.f32 %v416_v12, %v410_v15  ;;  %v423_v45 = vmul.f32 %v339_v27, %v231_v29  ;;  %v424_v46 = vmul.f32 %v339_v27, %v232_v30  ;;  %v244_v7 = vld [vmem:[%s1502_s5 + $0x1b8] sm:$0xff]  ;;  %v245_v12 = vld [vmem:[%s1502_s5 + $0x1c0] sm:$0xff]  ;;  %v247_v15 = vld [vmem:[%s1502_s5 + $0x1d0] sm:$0xff] }
  0xd8   : > { %v562_v51 = vrot.slane %v561_v25, 4  ;;  %v569_v43 = vrot.slane %v568_v26, 4  ;;  %v425_v52 = vmul.f32 %v339_v27, %v233_v16  ;;  %v426_v44 = vmul.f32 %v339_v27, %v234_v32 }
  0xd9   : > { %v576_v55 = vrot.slane %v575_v35, 4  ;;  %v583_v58 = vrot.slane %v582_v36, 4  ;;  %v427_v59 = vmul.f32 %v339_v27, %v235_v28  ;;  %v428_v60 = vmul.f32 %v339_v27, %v236_v33  ;;  %v248_v27 = vld [vmem:[%s1502_s5 + $0x1d8] sm:$0xff]  ;;  %v344_v28 = vpop.permute.xlu0 %343  ;;  %v237_v33 = vld [vmem:[%s1502_s5 + $0x180] sm:$0xff] }
  0xda   : > { %v417_v61 = vmul.f32 %v334_v48, %v225_v34  ;;  %v418_v62 = vmul.f32 %v334_v48, %v226_v41  ;;  %v419_v63 = vmul.f32 %v334_v48, %v227_v49  ;;  %v420_v0 = vmul.f32 %v334_v48, %v228_v42  ;;  %v238_v34 = vld [vmem:[%s1502_s5 + $0x188] sm:$0xff]  ;;  %v240_v41 = vld [vmem:[%s1502_s5 + $0x198] sm:$0xff]  ;;  %v241_v49 = vld [vmem:[%s1502_s5 + $0x1a0] sm:$0xff] }
  0xdb   : > { %v590_v1 = vrot.slane %v1645_v39, 4  ;;  %v597_v2 = vrot.slane %v1647_v40, 4  ;;  %v421_v3 = vmul.f32 %v334_v48, %v229_v53  ;;  %v422_v4 = vmul.f32 %v334_v48, %v230_v54  ;;  %v242_v42 = vld [vmem:[%s1502_s5 + $0x1a8] sm:$0xff] }
  0xdc   : > { %v603_v8 = vadd.f32 %v423_v45, %v417_v61  ;;  %v610_v9 = vadd.f32 %v424_v46, %v418_v62  ;;  %v617_v10 = vadd.f32 %v425_v52, %v419_v63  ;;  %v624_v11 = vadd.f32 %v426_v44, %v420_v0 }
  0xdd   : > { %v1660_v17 = vadd.f32 %v562_v51, %v561_v25  ;;  %v1662_v18 = vadd.f32 %v569_v43, %v568_v26  ;;  %v631_v19 = vadd.f32 %v427_v59, %v421_v3  ;;  %v638_v14 = vadd.f32 %v428_v60, %v422_v4  ;;  %v239_v25 = vld [vmem:[%s1502_s5 + $0x190] sm:$0xff]  ;;  %v359_v3 = vpop.permute.xlu1 %358 }
  0xde   : > { %v1666_v29 = vadd.f32 %v576_v55, %v575_v35  ;;  %v1668_v30 = vadd.f32 %v583_v58, %v582_v36  ;;  %v435_v16 = vmul.f32 %v349_v5, %v243_v6  ;;  %v436_v32 = vmul.f32 %v349_v5, %v244_v7  ;;  %v255_v4 = vld [vmem:[%s1502_s5 + $0x210] sm:$0xff] }
  0xdf   : > { %v604_v45 = vrot.slane %v603_v8, 4  ;;  %v611_v26 = vrot.slane %v610_v9, 4  ;;  %v437_v46 = vmul.f32 %v349_v5, %v245_v12  ;;  %v438_v48 = vmul.f32 %v349_v5, %v246_v13 }
  0xe0   : > { %v618_v51 = vrot.slane %v617_v10, 4  ;;  %v625_v43 = vrot.slane %v624_v11, 4  ;;  %v632_v35 = vrot.slane %v631_v19, 4  ;;  %v639_v36 = vrot.slane %v638_v14, 4 }
  0xe1   : > { %v439_v52 = vmul.f32 %v349_v5, %v247_v15  ;;  %v440_v44 = vmul.f32 %v349_v5, %v248_v27  ;;  %v429_v53 = vmul.f32 %v344_v28, %v237_v33  ;;  %v430_v54 = vmul.f32 %v344_v28, %v238_v34  ;;  %v256_v5 = vld [vmem:[%s1502_s5 + $0x218] sm:$0xff] }
  0xe2   : > { %v431_v55 = vmul.f32 %v344_v28, %v239_v25  ;;  %v432_v58 = vmul.f32 %v344_v28, %v240_v41  ;;  %v433_v59 = vmul.f32 %v344_v28, %v241_v49  ;;  %v434_v60 = vmul.f32 %v344_v28, %v242_v42  ;;  %v354_v25 = vpop.permute.xlu0 %353  ;;  %v254_v41 = vld [vmem:[%s1502_s5 + $0x208] sm:$0xff] }
  0xe3   : > { %v1677_v61 = vadd.f32 %v590_v1, %v1645_v39  ;;  %v1680_v62 = vadd.f32 %v597_v2, %v1647_v40  ;;  %v645_v63 = vadd.f32 %v435_v16, %v429_v53  ;;  %v652_v0 = vadd.f32 %v436_v32, %v430_v54  ;;  %v257_v39 = vld [vmem:[%s1502_s5 + $0x220] sm:$0xff]  ;;  %v258_v40 = vld [vmem:[%s1502_s5 + $0x228] sm:$0xff] }
  0xe4   : > { %v1684_v6 = vadd.f32 %v604_v45, %v603_v8  ;;  %v1686_v7 = vadd.f32 %v611_v26, %v610_v9  ;;  %v659_v12 = vadd.f32 %v437_v46, %v431_v55  ;;  %v666_v13 = vadd.f32 %v438_v48, %v432_v58  ;;  %v259_v8 = vld [vmem:[%s1502_s5 + $0x230] sm:$0xff]  ;;  %v260_v9 = vld [vmem:[%s1502_s5 + $0x238] sm:$0xff]  ;;  %v249_v16 = vld [vmem:[%s1502_s5 + $0x1e0] sm:$0xff] }
  0xe5   : > { %2089 = vst [vmem:[#allocation8_spill] sm:$0xff] %v1677_v61  ;;  %2090 = vst [vmem:[#allocation9_spill] sm:$0xff] %v1680_v62  ;;  %v1690_v1 = vadd.f32 %v618_v51, %v617_v10  ;;  %v1692_v2 = vadd.f32 %v625_v43, %v624_v11  ;;  %v1694_v15 = vadd.f32 %v632_v35, %v631_v19  ;;  %v250_v10 = vld [vmem:[%s1502_s5 + $0x1e8] sm:$0xff]  ;;  %v251_v45 = vld [vmem:[%s1502_s5 + $0x1f0] sm:$0xff]  ;;  %v646_v26 = vrot.slane %v645_v63, 4 }
  0xe6   : > { %v1696_v27 = vadd.f32 %v639_v36, %v638_v14  ;;  %v1701_v32 = vadd.f32 %v439_v52, %v433_v59  ;;  %v1703_v28 = vadd.f32 %v440_v44, %v434_v60  ;;  %v447_v33 = vmul.f32 %v359_v3, %v255_v4  ;;  %v252_v11 = vld [vmem:[%s1502_s5 + $0x1f8] sm:$0xff]  ;;  %v253_v48 = vld [vmem:[%s1502_s5 + $0x200] sm:$0xff]  ;;  %v369_v59 = vpop.permute.xlu1 %368  ;;  %v267_v60 = vld [vmem:[%s1502_s5 + $0x270] sm:$0xff] }
  0xe7   : > { %v448_v34 = vmul.f32 %v359_v3, %v256_v5  ;;  %v653_v19 = vrot.slane %v652_v0, 4  ;;  %v449_v46 = vmul.f32 %v359_v3, %v257_v39  ;;  %v450_v14 = vmul.f32 %v359_v3, %v258_v40  ;;  %v268_v4 = vld [vmem:[%s1502_s5 + $0x278] sm:$0xff] }
  0xe8   : > { %v660_v49 = vrot.slane %v659_v12, 4  ;;  %v667_v42 = vrot.slane %v666_v13, 4  ;;  %v451_v51 = vmul.f32 %v359_v3, %v259_v8  ;;  %v452_v43 = vmul.f32 %v359_v3, %v260_v9  ;;  %v269_v8 = vld [vmem:[%s1502_s5 + $0x280] sm:$0xff]  ;;  %v270_v9 = vld [vmem:[%s1502_s5 + $0x288] sm:$0xff] }
  0xe9   : > { %v441_v35 = vmul.f32 %v354_v25, %v249_v16  ;;  %v442_v36 = vmul.f32 %v354_v25, %v250_v10  ;;  %v443_v52 = vmul.f32 %v354_v25, %v251_v45  ;;  %v444_v44 = vmul.f32 %v354_v25, %v252_v11 }
  0xea   : > { %v674_v53 = vrot.slane %v1701_v32, 4  ;;  %v681_v54 = vrot.slane %v1703_v28, 4  ;;  %v445_v55 = vmul.f32 %v354_v25, %v253_v48  ;;  %v446_v58 = vmul.f32 %v354_v25, %v254_v41  ;;  %v271_v25 = vld [vmem:[%s1502_s5 + $0x290] sm:$0xff]  ;;  %v272_v48 = vld [vmem:[%s1502_s5 + $0x298] sm:$0xff]  ;;  %v364_v41 = vpop.permute.xlu0 %363 }
  0xeb   : > { %v687_v5 = vadd.f32 %v447_v33, %v441_v35  ;;  %v694_v39 = vadd.f32 %v448_v34, %v442_v36  ;;  %v701_v3 = vadd.f32 %v449_v46, %v443_v52  ;;  %v708_v40 = vadd.f32 %v450_v14, %v444_v44  ;;  %v261_v35 = vld [vmem:[%s1502_s5 + $0x240] sm:$0xff]  ;;  %v262_v36 = vld [vmem:[%s1502_s5 + $0x248] sm:$0xff]  ;;  %v264_v52 = vld [vmem:[%s1502_s5 + $0x258] sm:$0xff] }
  0xec   : > { %v1716_v16 = vadd.f32 %v646_v26, %v645_v63  ;;  %v1718_v10 = vadd.f32 %v653_v19, %v652_v0  ;;  %v715_v45 = vadd.f32 %v451_v51, %v445_v55  ;;  %v722_v11 = vadd.f32 %v452_v43, %v446_v58  ;;  %v263_v63 = vld [vmem:[%s1502_s5 + $0x250] sm:$0xff]  ;;  %v265_v43 = vld [vmem:[%s1502_s5 + $0x260] sm:$0xff]  ;;  %v266_v44 = vld [vmem:[%s1502_s5 + $0x268] sm:$0xff] }
  0xed   : > { %v1722_v33 = vadd.f32 %v660_v49, %v659_v12  ;;  %v1724_v34 = vadd.f32 %v667_v42, %v666_v13  ;;  %v459_v46 = vmul.f32 %v369_v59, %v267_v60  ;;  %v460_v14 = vmul.f32 %v369_v59, %v268_v4 }
  0xee   : > { %2091 = vst [vmem:[#allocation10_spill] sm:$0xff] %v1716_v16  ;;  %2092 = vst [vmem:[#allocation11_spill] sm:$0xff] %v1718_v10  ;;  %v688_v26 = vrot.slane %v687_v5, 4  ;;  %v695_v0 = vrot.slane %v694_v39, 4  ;;  %v461_v19 = vmul.f32 %v369_v59, %v269_v8  ;;  %v462_v51 = vmul.f32 %v369_v59, %v270_v9 }
  0xef   : > { %2093 = vst [vmem:[#allocation12_spill] sm:$0xff] %v1722_v33  ;;  %2094 = vst [vmem:[#allocation13_spill] sm:$0xff] %v1724_v34  ;;  %v702_v55 = vrot.slane %v701_v3, 4  ;;  %v709_v58 = vrot.slane %v708_v40, 4  ;;  %v716_v12 = vrot.slane %v715_v45, 4  ;;  %v723_v13 = vrot.slane %v722_v11, 4 }
  0xf0   : > { %v463_v49 = vmul.f32 %v369_v59, %v271_v25  ;;  %v464_v42 = vmul.f32 %v369_v59, %v272_v48  ;;  %v453_v60 = vmul.f32 %v364_v41, %v261_v35  ;;  %v454_v4 = vmul.f32 %v364_v41, %v262_v36  ;;  %v379_v59 = vpop.permute.xlu1 %378  ;;  %v279_v25 = vld [vmem:[%s1502_s5 + $0x2d0] sm:$0xff]  ;;  %v280_v48 = vld [vmem:[%s1502_s5 + $0x2d8] sm:$0xff] }
  0xf1   : > { %v455_v34 = vmul.f32 %v364_v41, %v263_v63  ;;  %v456_v33 = vmul.f32 %v364_v41, %v264_v52  ;;  %v457_v8 = vmul.f32 %v364_v41, %v265_v43  ;;  %v458_v9 = vmul.f32 %v364_v41, %v266_v44 }
  0xf2   : > { %v1733_v10 = vadd.f32 %v674_v53, %v1701_v32  ;;  %v1736_v16 = vadd.f32 %v681_v54, %v1703_v28  ;;  %v1738_v62 = vadd.f32 %v459_v46, %v453_v60  ;;  %v1740_v61 = vadd.f32 %v460_v14, %v454_v4  ;;  %v281_v28 = vld [vmem:[%s1502_s5 + $0x2e0] sm:$0xff]  ;;  %v282_v53 = vld [vmem:[%s1502_s5 + $0x2e8] sm:$0xff] }
  0xf3   : > { %v1744_v35 = vadd.f32 %v688_v26, %v687_v5  ;;  %v1746_v36 = vadd.f32 %v695_v0, %v694_v39  ;;  %v1748_v41 = vadd.f32 %v702_v55, %v701_v3  ;;  %v1750_v32 = vadd.f32 %v709_v58, %v708_v40  ;;  %v273_v54 = vld [vmem:[%s1502_s5 + $0x2a0] sm:$0xff]  ;;  %v374_v39 = vpop.permute.xlu0 %373  ;;  %v274_v3 = vld [vmem:[%s1502_s5 + $0x2a8] sm:$0xff]  ;;  %v275_v26 = vld [vmem:[%s1502_s5 + $0x2b0] sm:$0xff] }
  0xf4   : > { %v1755_v46 = vadd.f32 %v716_v12, %v715_v45  ;;  %v1757_v14 = vadd.f32 %v723_v13, %v722_v11  ;;  %v1759_v63 = vadd.f32 %v461_v19, %v455_v34  ;;  %v1761_v5 = vadd.f32 %v462_v51, %v456_v33  ;;  %v276_v40 = vld [vmem:[%s1502_s5 + $0x2b8] sm:$0xff]  ;;  %v283_v34 = vld [vmem:[%s1502_s5 + $0x2f0] sm:$0xff]  ;;  %v277_v51 = vld [vmem:[%s1502_s5 + $0x2c0] sm:$0xff] }
  0xf5   : > { %v1766_v0 = vadd.f32 %v463_v49, %v457_v8  ;;  %v1768_v52 = vadd.f32 %v464_v42, %v458_v9  ;;  %v471_v43 = vmul.f32 %v379_v59, %v279_v25  ;;  %v472_v44 = vmul.f32 %v379_v59, %v280_v48  ;;  %v284_v19 = vld [vmem:[%s1502_s5 + $0x2f8] sm:$0xff]  ;;  %v278_v58 = vld [vmem:[%s1502_s5 + $0x2c8] sm:$0xff] }
  0xf6   : > { %2095 = vst [vmem:[#allocation14_spill] sm:$0xff] %v1761_v5  ;;  %v473_v55 = vmul.f32 %v379_v59, %v281_v28  ;;  %v474_v33 = vmul.f32 %v379_v59, %v282_v53  ;;  %v465_v12 = vmul.f32 %v374_v39, %v273_v54  ;;  %v466_v13 = vmul.f32 %v374_v39, %v274_v3 }
  0xf7   : > { %2096 = vst [vmem:[#allocation15_spill] sm:$0xff] %v1768_v52  ;;  %v467_v60 = vmul.f32 %v374_v39, %v275_v26  ;;  %v468_v4 = vmul.f32 %v374_v39, %v276_v40  ;;  %v522_v8 = vrot.slane %v1605_v50, 2  ;;  %v529_v9 = vrot.slane %v1607_v47, 2 }
  0xf8   : > { %v475_v28 = vmul.f32 %v379_v59, %v283_v34  ;;  %v476_v53 = vmul.f32 %v379_v59, %v284_v19  ;;  %v469_v11 = vmul.f32 %v374_v39, %v277_v51  ;;  %v470_v45 = vmul.f32 %v374_v39, %v278_v58 }
  0xf9   : > { %v523_v54 = vadd.f32 %v522_v8, %v1605_v50  ;;  %v530_v3 = vadd.f32 %v529_v9, %v1607_v47  ;;  %v1784_v26 = vadd.f32 %v471_v43, %v465_v12  ;;  %v1786_v40 = vadd.f32 %v472_v44, %v466_v13 }
  0xfa   : > { %v1788_v42 = vadd.f32 %v473_v55, %v467_v60  ;;  %v1790_v49 = vadd.f32 %v474_v33, %v468_v4  ;;  %v536_v48 = vrot.slane %v1612_v56, 2  ;;  %v543_v59 = vrot.slane %v1614_v57, 2 }
  0xfb   : > { %v524_v5 = vrot.slane %v523_v54, 1  ;;  %v531_v25 = vrot.slane %v530_v3, 1  ;;  %v550_v39 = vrot.slane %v1622_v20, 2  ;;  %v557_v50 = vrot.slane %v1624_v24, 2 }
  0xfc   : > { %v480_v47 = vrot.slane %v1628_v31, 2  ;;  %v487_v43 = vrot.slane %v1630_v21, 2  ;;  %v1798_v44 = vadd.f32 %v475_v28, %v469_v11  ;;  %v1800_v34 = vadd.f32 %v476_v53, %v470_v45  ;;  %v910_v11 = vpop.permute.xlu1 %909 }
  0xfd   : > { %v537_v19 = vadd.f32 %v536_v48, %v1612_v56  ;;  %v544_v55 = vadd.f32 %v543_v59, %v1614_v57  ;;  %v551_v58 = vadd.f32 %v550_v39, %v1622_v20  ;;  %v558_v12 = vadd.f32 %v557_v50, %v1624_v24 }
  0xfe   : > { %v481_v45 = vadd.f32 %v480_v47, %v1628_v31  ;;  %v488_v4 = vadd.f32 %v487_v43, %v1630_v21  ;;  %v525_v56 = vadd.f32 %v524_v5, %v523_v54  ;;  %v532_v8 = vadd.f32 %v531_v25, %v530_v3 }
  0xff   : > { %v538_v57 = vrot.slane %v537_v19, 1  ;;  %v545_v9 = vrot.slane %v544_v55, 1  ;;  %v552_v48 = vrot.slane %v551_v58, 1  ;;  %v559_v28 = vrot.slane %v558_v12, 1 }
 0x100   : > { %v494_v53 = vrot.slane %v1634_v37, 2  ;;  %v501_v20 = vrot.slane %v1636_v38, 2  ;;  %v948_v39 = vmul.f32 %v910_v11, %v525_v56  ;;  %v949_v50 = vmul.f32 %v910_v11, %v532_v8 }
 0x101   : > { %v482_v31 = vrot.slane %v481_v45, 1  ;;  %v489_v47 = vrot.slane %v488_v4, 1  ;;  %v539_v25 = vadd.f32 %v538_v57, %v537_v19  ;;  %v546_v54 = vadd.f32 %v545_v9, %v544_v55 }
 0x102   : > { %v495_v21 = vadd.f32 %v494_v53, %v1634_v37  ;;  %v502_v5 = vadd.f32 %v501_v20, %v1636_v38  ;;  %v508_v3 = vrot.slane %v1638_v22, 2  ;;  %v515_v43 = vrot.slane %v1640_v23, 2  ;;  %v905_v53 = vpop.permute.xlu0 %904 }
 0x103   : > { %v553_v60 = vadd.f32 %v552_v48, %v551_v58  ;;  %v560_v13 = vadd.f32 %v559_v28, %v558_v12  ;;  %v606_v59 = vrot.slane %v1684_v6, 2  ;;  %v613_v37 = vrot.slane %v1686_v7, 2 }
 0x104   : > { %v496_v24 = vrot.slane %v495_v21, 1  ;;  %v503_v51 = vrot.slane %v502_v5, 1  ;;  %v509_v56 = vadd.f32 %v508_v3, %v1638_v22  ;;  %v516_v8 = vadd.f32 %v515_v43, %v1640_v23 }
 0x105   : > { %v483_v38 = vadd.f32 %v482_v31, %v481_v45  ;;  %v490_v19 = vadd.f32 %v489_v47, %v488_v4  ;;  %v607_v58 = vadd.f32 %v606_v59, %v1684_v6  ;;  %v614_v12 = vadd.f32 %v613_v37, %v1686_v7 }
 0x106   : > { %v497_v55 = vadd.f32 %v496_v24, %v495_v21  ;;  %v504_v57 = vadd.f32 %v503_v51, %v502_v5  ;;  %v510_v9 = vrot.slane %v509_v56, 1  ;;  %v517_v20 = vrot.slane %v516_v8, 1 }
 0x107   : > { %v950_v48 = vmul.f32 %v910_v11, %v539_v25  ;;  %v951_v28 = vmul.f32 %v910_v11, %v546_v54  ;;  %v620_v22 = vrot.slane %v1690_v1, 2  ;;  %v627_v23 = vrot.slane %v1692_v2, 2 }
 0x108   : > { %v942_v3 = vmul.f32 %v905_v53, %v483_v38  ;;  %v943_v43 = vmul.f32 %v905_v53, %v490_v19  ;;  %v944_v33 = vmul.f32 %v905_v53, %v497_v55  ;;  %v945_v52 = vmul.f32 %v905_v53, %v504_v57  ;;  %v920_v55 = vpop.permute.xlu1 %919 }
 0x109   : > { %v511_v45 = vadd.f32 %v510_v9, %v509_v56  ;;  %v518_v4 = vadd.f32 %v517_v20, %v516_v8  ;;  %v608_v24 = vrot.slane %v607_v58, 1  ;;  %v615_v51 = vrot.slane %v614_v12, 1 }
 0x10a   : > { %v952_v31 = vmul.f32 %v910_v11, %v553_v60  ;;  %v953_v47 = vmul.f32 %v910_v11, %v560_v13  ;;  %v621_v6 = vadd.f32 %v620_v22, %v1690_v1  ;;  %v628_v7 = vadd.f32 %v627_v23, %v1692_v2 }
 0x10b   : > { %v946_v59 = vmul.f32 %v905_v53, %v511_v45  ;;  %v947_v21 = vmul.f32 %v905_v53, %v518_v4  ;;  %v634_v5 = vrot.slane %v1694_v15, 2  ;;  %v641_v25 = vrot.slane %v1696_v27, 2 }
 0x10c   : > { %v1833_v54 = vsel %vm1038_vm1, %v948_v39, %v942_v3  ;;  %v1836_v56 = vsel %vm1038_vm1, %v949_v50, %v943_v43  ;;  %v1839_v8 = vsel %vm1038_vm1, %v950_v48, %v944_v33  ;;  %v1842_v13 = vsel %vm1038_vm1, %v951_v28, %v945_v52  ;;  %v2098_v28 = vld [vmem:[#allocation9_spill] sm:$0xff] }
 0x10d   : > { %v609_v1 = vadd.f32 %v608_v24, %v607_v58  ;;  %v616_v2 = vadd.f32 %v615_v51, %v614_v12  ;;  %v635_v60 = vadd.f32 %v634_v5, %v1694_v15  ;;  %v642_v11 = vadd.f32 %v641_v25, %v1696_v27  ;;  %v2097_v12 = vld [vmem:[#allocation8_spill] sm:$0xff]  ;;  %v915_v51 = vpop.permute.xlu0 %914 }
 0x10e   : > { %v564_v37 = vrot.slane %v1660_v17, 2  ;;  %v571_v39 = vrot.slane %v1662_v18, 2  ;;  %v578_v53 = vrot.slane %v1666_v29, 2  ;;  %v585_v50 = vrot.slane %v1668_v30, 2 }
 0x10f   : > { %v1851_v33 = vsel %vm1038_vm1, %v952_v31, %v946_v59  ;;  %v1854_v52 = vsel %vm1038_vm1, %v953_v47, %v947_v21  ;;  %v622_v38 = vrot.slane %v621_v6, 1  ;;  %v629_v19 = vrot.slane %v628_v7, 1 }
 0x110   : > { %v565_v15 = vadd.f32 %v564_v37, %v1660_v17  ;;  %v572_v27 = vadd.f32 %v571_v39, %v1662_v18  ;;  %v579_v57 = vadd.f32 %v578_v53, %v1666_v29  ;;  %v586_v9 = vadd.f32 %v585_v50, %v1668_v30 }
 0x111   : > { %v636_v20 = vrot.slane %v635_v60, 1  ;;  %v643_v58 = vrot.slane %v642_v11, 1  ;;  %v592_v48 = vrot.slane %v2097_v12, 2  ;;  %v599_v22 = vrot.slane %v2098_v28, 2 }
 0x112   : > { %v566_v23 = vrot.slane %v565_v15, 1  ;;  %v573_v3 = vrot.slane %v572_v27, 1  ;;  %v580_v43 = vrot.slane %v579_v57, 1  ;;  %v587_v45 = vrot.slane %v586_v9, 1 }
 0x113   : > { %v1862_v4 = vmul.f32 %v920_v55, %v609_v1  ;;  %v1864_v24 = vmul.f32 %v920_v55, %v616_v2  ;;  %v593_v17 = vadd.f32 %v592_v48, %v2097_v12  ;;  %v600_v18 = vadd.f32 %v599_v22, %v2098_v28 }
 0x114   : > { %v623_v29 = vadd.f32 %v622_v38, %v621_v6  ;;  %v630_v30 = vadd.f32 %v629_v19, %v628_v7  ;;  %v567_v31 = vadd.f32 %v566_v23, %v565_v15  ;;  %v574_v47 = vadd.f32 %v573_v3, %v572_v27 }
 0x115   : > { %v594_v59 = vrot.slane %v593_v17, 1  ;;  %v601_v21 = vrot.slane %v600_v18, 1  ;;  %v690_v5 = vrot.slane %v1744_v35, 2  ;;  %v697_v25 = vrot.slane %v1746_v36, 2 }
 0x116   : > { %v637_v37 = vadd.f32 %v636_v20, %v635_v60  ;;  %v644_v1 = vadd.f32 %v643_v58, %v642_v11  ;;  %v581_v39 = vadd.f32 %v580_v43, %v579_v57  ;;  %v588_v2 = vadd.f32 %v587_v45, %v586_v9 }
 0x117   : > { %v1870_v53 = vmul.f32 %v920_v55, %v623_v29  ;;  %v1872_v50 = vmul.f32 %v920_v55, %v630_v30  ;;  %v954_v12 = vmul.f32 %v915_v51, %v567_v31  ;;  %v955_v6 = vmul.f32 %v915_v51, %v574_v47  ;;  %v2100_v30 = vld [vmem:[#allocation11_spill] sm:$0xff] }
 0x118   : > { %v1874_v7 = vmul.f32 %v920_v55, %v637_v37  ;;  %v1876_v38 = vmul.f32 %v920_v55, %v644_v1  ;;  %v956_v19 = vmul.f32 %v915_v51, %v581_v39  ;;  %v957_v15 = vmul.f32 %v915_v51, %v588_v2  ;;  %v930_v39 = vpop.permute.xlu1 %929 }
 0x119   : > { %v595_v27 = vadd.f32 %v594_v59, %v593_v17  ;;  %v602_v48 = vadd.f32 %v601_v21, %v600_v18  ;;  %v691_v28 = vadd.f32 %v690_v5, %v1744_v35  ;;  %v698_v60 = vadd.f32 %v697_v25, %v1746_v36  ;;  %v2099_v18 = vld [vmem:[#allocation10_spill] sm:$0xff] }
 0x11a   : > { %v704_v11 = vrot.slane %v1748_v41, 2  ;;  %v711_v57 = vrot.slane %v1750_v32, 2  ;;  %v718_v9 = vrot.slane %v1755_v46, 2  ;;  %v725_v20 = vrot.slane %v1757_v14, 2 }
 0x11b   : > { %v958_v58 = vmul.f32 %v915_v51, %v595_v27  ;;  %v959_v22 = vmul.f32 %v915_v51, %v602_v48  ;;  %v1041_v55 = vsel %vm1040_vm2, %v954_v12, %v1833_v54  ;;  %v1053_v23 = vsel %vm1040_vm2, %v955_v6, %v1836_v56 }
 0x11c   : > { %v705_v35 = vadd.f32 %v704_v11, %v1748_v41  ;;  %v712_v36 = vadd.f32 %v711_v57, %v1750_v32  ;;  %v719_v3 = vadd.f32 %v718_v9, %v1755_v46  ;;  %v726_v43 = vadd.f32 %v725_v20, %v1757_v14  ;;  %v2101_v32 = vld [vmem:[#allocation12_spill] sm:$0xff]  ;;  %v2102_v46 = vld [vmem:[#allocation13_spill] sm:$0xff] }
 0x11d   : > { %v692_v45 = vrot.slane %v691_v28, 1  ;;  %v699_v17 = vrot.slane %v698_v60, 1  ;;  %v648_v29 = vrot.slane %v2099_v18, 2  ;;  %v655_v51 = vrot.slane %v2100_v30, 2 }
 0x11e   : > { %v706_v31 = vrot.slane %v705_v35, 1  ;;  %v713_v54 = vrot.slane %v712_v36, 1  ;;  %v720_v47 = vrot.slane %v719_v3, 1  ;;  %v727_v59 = vrot.slane %v726_v43, 1 }
 0x11f   : > { %v649_v56 = vadd.f32 %v648_v29, %v2099_v18  ;;  %v656_v41 = vadd.f32 %v655_v51, %v2100_v30  ;;  %v662_v21 = vrot.slane %v2101_v32, 2  ;;  %v669_v5 = vrot.slane %v2102_v46, 2 }
 0x120   : > { %v1060_v14 = vsel %vm1040_vm2, %v956_v19, %v1839_v8  ;;  %v1067_v25 = vsel %vm1040_vm2, %v957_v15, %v1842_v13  ;;  %v1904_v37 = vsel %vm1040_vm2, %v958_v58, %v1851_v33  ;;  %v1908_v1 = vsel %vm1040_vm2, %v959_v22, %v1854_v52 }
 0x121   : > { %v693_v2 = vadd.f32 %v692_v45, %v691_v28  ;;  %v700_v12 = vadd.f32 %v699_v17, %v698_v60  ;;  %v663_v6 = vadd.f32 %v662_v21, %v2101_v32  ;;  %v670_v27 = vadd.f32 %v669_v5, %v2102_v46 }
 0x122   : > { %v707_v48 = vadd.f32 %v706_v31, %v705_v35  ;;  %v714_v8 = vadd.f32 %v713_v54, %v712_v36  ;;  %v650_v19 = vrot.slane %v649_v56, 1  ;;  %v657_v11 = vrot.slane %v656_v41, 1  ;;  %v925_v36 = vpop.permute.xlu0 %924 }
 0x123   : > { %v721_v13 = vadd.f32 %v720_v47, %v719_v3  ;;  %v728_v15 = vadd.f32 %v727_v59, %v726_v43  ;;  %v664_v33 = vrot.slane %v663_v6, 1  ;;  %v671_v57 = vrot.slane %v670_v27, 1 }
 0x124   : > { %v1912_v9 = vmul.f32 %v930_v39, %v693_v2  ;;  %v1914_v52 = vmul.f32 %v930_v39, %v700_v12  ;;  %v676_v28 = vrot.slane %v1733_v10, 2  ;;  %v683_v60 = vrot.slane %v1736_v16, 2 }
 0x125   : > { %v1918_v20 = vmul.f32 %v930_v39, %v707_v48  ;;  %v1920_v58 = vmul.f32 %v930_v39, %v714_v8  ;;  %v1922_v22 = vmul.f32 %v930_v39, %v721_v13  ;;  %v1924_v35 = vmul.f32 %v930_v39, %v728_v15 }
 0x126   : > { %v651_v3 = vadd.f32 %v650_v19, %v649_v56  ;;  %v658_v43 = vadd.f32 %v657_v11, %v656_v41  ;;  %v677_v45 = vadd.f32 %v676_v28, %v1733_v10  ;;  %v684_v17 = vadd.f32 %v683_v60, %v1736_v16 }
 0x127   : > { %v665_v18 = vadd.f32 %v664_v33, %v663_v6  ;;  %v672_v29 = vadd.f32 %v671_v57, %v670_v27  ;;  %v1043_v30 = vsel %vm1042_vm3, %v1862_v4, %v1041_v55  ;;  %v1054_v51 = vsel %vm1042_vm3, %v1864_v24, %v1053_v23 }
 0x128   : > { %v678_v31 = vrot.slane %v677_v45, 1  ;;  %v685_v54 = vrot.slane %v684_v17, 1  ;;  %v966_v47 = vmul.f32 %v925_v36, %v651_v3  ;;  %v967_v59 = vmul.f32 %v925_v36, %v658_v43 }
 0x129   : > { %v1061_v56 = vsel %vm1042_vm3, %v1870_v53, %v1060_v14  ;;  %v1068_v10 = vsel %vm1042_vm3, %v1872_v50, %v1067_v25  ;;  %v2103_v16 = vrot.slane %v1784_v26, 4  ;;  %v2104_v4 = vrot.slane %v1786_v40, 4 }
 0x12a   : > { %v968_v32 = vmul.f32 %v925_v36, %v665_v18  ;;  %v969_v24 = vmul.f32 %v925_v36, %v672_v29  ;;  %v2105_v23 = vrot.slane %v1788_v42, 4  ;;  %v2106_v53 = vrot.slane %v1790_v49, 4 }
 0x12b   : > { %v773_v41 = vadd.f32 %v2103_v16, %v1784_v26  ;;  %v780_v55 = vadd.f32 %v2104_v4, %v1786_v40  ;;  %v2107_v14 = vrot.slane %v1798_v44, 4  ;;  %v2108_v25 = vrot.slane %v1800_v34, 4  ;;  %v2112_v4 = vld [vmem:[#allocation14_spill] sm:$0xff] }
 0x12c   : > { %v787_v21 = vadd.f32 %v2105_v23, %v1788_v42  ;;  %v794_v46 = vadd.f32 %v2106_v53, %v1790_v49  ;;  %v679_v39 = vadd.f32 %v678_v31, %v677_v45  ;;  %v686_v2 = vadd.f32 %v685_v54, %v684_v17 }
 0x12d   : > { %v774_v5 = vrot.slane %v773_v41, 2  ;;  %v781_v50 = vrot.slane %v780_v55, 2  ;;  %v801_v26 = vadd.f32 %v2107_v14, %v1798_v44  ;;  %v808_v40 = vadd.f32 %v2108_v25, %v1800_v34 }
 0x12e   : > { %v788_v12 = vrot.slane %v787_v21, 2  ;;  %v795_v6 = vrot.slane %v794_v46, 2  ;;  %v1045_v49 = vsel %vm1044_vm4, %v966_v47, %v1043_v30  ;;  %v1055_v19 = vsel %vm1044_vm4, %v967_v59, %v1054_v51 }
 0x12f   : > { %v775_v27 = vadd.f32 %v774_v5, %v773_v41  ;;  %v782_v42 = vadd.f32 %v781_v50, %v780_v55  ;;  %v802_v48 = vrot.slane %v801_v26, 2  ;;  %v809_v8 = vrot.slane %v808_v40, 2  ;;  %v2115_v5 = vld [vmem:[#allocation15_spill] sm:$0xff] }
 0x130   : > { %v789_v11 = vadd.f32 %v788_v12, %v787_v21  ;;  %v796_v13 = vadd.f32 %v795_v6, %v794_v46  ;;  %v970_v15 = vmul.f32 %v925_v36, %v679_v39  ;;  %v971_v44 = vmul.f32 %v925_v36, %v686_v2 }
 0x131   : > { %v803_v33 = vadd.f32 %v802_v48, %v801_v26  ;;  %v810_v57 = vadd.f32 %v809_v8, %v808_v40  ;;  %v776_v28 = vrot.slane %v775_v27, 1  ;;  %v783_v34 = vrot.slane %v782_v42, 1  ;;  %v935_v40 = vpop.permute.xlu0 %934 }
 0x132   : > { %v2109_v60 = vrot.slane %v1738_v62, 4  ;;  %v2110_v43 = vrot.slane %v1740_v61, 4  ;;  %v1075_v17 = vsel %vm1042_vm3, %v1874_v7, %v1904_v37  ;;  %v1082_v36 = vsel %vm1042_vm3, %v1876_v38, %v1908_v1 }
 0x133   : > { %v790_v18 = vrot.slane %v789_v11, 1  ;;  %v797_v29 = vrot.slane %v796_v13, 1  ;;  %v1969_v30 = vsel %vm1044_vm4, %v968_v32, %v1061_v56  ;;  %v1975_v31 = vsel %vm1044_vm4, %v970_v15, %v1075_v17 }
 0x134   : > { %v731_v3 = vadd.f32 %v2109_v60, %v1738_v62  ;;  %v738_v45 = vadd.f32 %v2110_v43, %v1740_v61  ;;  %v1972_v62 = vsel %vm1044_vm4, %v969_v24, %v1068_v10  ;;  %v1978_v7 = vsel %vm1044_vm4, %v971_v44, %v1082_v36  ;;  %v940_v24 = vpop.permute.xlu1 %939 }
 0x135   : > { %v804_v37 = vrot.slane %v803_v33, 1  ;;  %v811_v38 = vrot.slane %v810_v57, 1  ;;  %v777_v1 = vadd.f32 %v776_v28, %v775_v27  ;;  %v784_v54 = vadd.f32 %v783_v34, %v782_v42 }
 0x136   : > { %v732_v51 = vrot.slane %v731_v3, 2  ;;  %v739_v61 = vrot.slane %v738_v45, 2  ;;  %v791_v56 = vadd.f32 %v790_v18, %v789_v11  ;;  %v798_v16 = vadd.f32 %v797_v29, %v796_v13 }
 0x137   : > { %v2111_v10 = vrot.slane %v1759_v63, 4  ;;  %v2113_v55 = vrot.slane %v2112_v4, 4  ;;  %v2114_v53 = vrot.slane %v1766_v0, 4  ;;  %v2116_v50 = vrot.slane %v2115_v5, 4 }
 0x138   : > { %v733_v47 = vadd.f32 %v732_v51, %v731_v3  ;;  %v740_v59 = vadd.f32 %v739_v61, %v738_v45  ;;  %v805_v26 = vadd.f32 %v804_v37, %v803_v33  ;;  %v812_v25 = vadd.f32 %v811_v38, %v810_v57 }
 0x139   : > { %v745_v41 = vadd.f32 %v2111_v10, %v1759_v63  ;;  %v752_v32 = vadd.f32 %v2113_v55, %v2112_v4  ;;  %v759_v46 = vadd.f32 %v2114_v53, %v1766_v0  ;;  %v766_v14 = vadd.f32 %v2116_v50, %v2115_v5 }
 0x13a   : > { %v734_v23 = vrot.slane %v733_v47, 1  ;;  %v741_v21 = vrot.slane %v740_v59, 1  ;;  %v984_v42 = vmul.f32 %v940_v24, %v777_v1  ;;  %v985_v48 = vmul.f32 %v940_v24, %v784_v54 }
 0x13b   : > { %v746_v63 = vrot.slane %v745_v41, 2  ;;  %v753_v39 = vrot.slane %v752_v32, 2  ;;  %v760_v6 = vrot.slane %v759_v46, 2  ;;  %v767_v27 = vrot.slane %v766_v14, 2 }
 0x13c   : > { %v735_v2 = vadd.f32 %v734_v23, %v733_v47  ;;  %v742_v12 = vadd.f32 %v741_v21, %v740_v59  ;;  %v1047_v57 = vsel %vm1046_vm5, %v1912_v9, %v1045_v49  ;;  %v1056_v34 = vsel %vm1046_vm5, %v1914_v52, %v1055_v19 }
 0x13d   : > { %v747_v8 = vadd.f32 %v746_v63, %v745_v41  ;;  %v754_v11 = vadd.f32 %v753_v39, %v752_v32  ;;  %v761_v13 = vadd.f32 %v760_v6, %v759_v46  ;;  %v768_v0 = vadd.f32 %v767_v27, %v766_v14 }
 0x13e   : > { %v978_v15 = vmul.f32 %v935_v40, %v735_v2  ;;  %v979_v44 = vmul.f32 %v935_v40, %v742_v12  ;;  %v986_v51 = vmul.f32 %v940_v24, %v791_v56  ;;  %v987_v61 = vmul.f32 %v940_v24, %v798_v16 }
 0x13f   : > { %v748_v28 = vrot.slane %v747_v8, 1  ;;  %v755_v33 = vrot.slane %v754_v11, 1  ;;  %v762_v60 = vrot.slane %v761_v13, 1  ;;  %v769_v3 = vrot.slane %v768_v0, 1 }
 0x140   : > { %v1049_v43 = vsel %vm1048_vm6, %v978_v15, %v1047_v57  ;;  %v1057_v45 = vsel %vm1048_vm6, %v979_v44, %v1056_v34  ;;  %v988_v52 = vmul.f32 %v940_v24, %v805_v26  ;;  %v989_v49 = vmul.f32 %v940_v24, %v812_v25 }
 0x141   : > { %v749_v17 = vadd.f32 %v748_v28, %v747_v8  ;;  %v756_v36 = vadd.f32 %v755_v33, %v754_v11  ;;  %v1051_v18 = vsel %vm1050_vm7, %v984_v42, %v1049_v43  ;;  %v1058_v29 = vsel %vm1050_vm7, %v985_v48, %v1057_v45 }
 0x142   : > { %v763_v37 = vadd.f32 %v762_v60, %v761_v13  ;;  %v770_v9 = vadd.f32 %v769_v3, %v768_v0  ;;  %1093 = vst [vmem:[%s180_s7] sm:$0xff] %v1051_v18  ;;  %1094 = vst [vmem:[%s180_s7 + $0x8] sm:$0xff] %v1058_v29  ;;  %v1063_v47 = vsel %vm1046_vm5, %v1918_v20, %v1969_v30 }
 0x143   : > { %v980_v19 = vmul.f32 %v935_v40, %v749_v17  ;;  %v981_v38 = vmul.f32 %v935_v40, %v756_v36  ;;  %v1070_v59 = vsel %vm1046_vm5, %v1920_v58, %v1972_v62  ;;  %v1077_v10 = vsel %vm1046_vm5, %v1922_v22, %v1975_v31 }
 0x144   : > { %v982_v1 = vmul.f32 %v935_v40, %v763_v37  ;;  %v983_v54 = vmul.f32 %v935_v40, %v770_v9  ;;  %v1084_v41 = vsel %vm1046_vm5, %v1924_v35, %v1978_v7 }
 0x145   : > { %v1064_v56 = vsel %vm1048_vm6, %v980_v19, %v1063_v47  ;;  %v1071_v16 = vsel %vm1048_vm6, %v981_v38, %v1070_v59 }
 0x146   : > { %v1065_v20 = vsel %vm1050_vm7, %v986_v51, %v1064_v56  ;;  %v1072_v30 = vsel %vm1050_vm7, %v987_v61, %v1071_v16  ;;  %v1078_v58 = vsel %vm1048_vm6, %v982_v1, %v1077_v10  ;;  %v1085_v62 = vsel %vm1048_vm6, %v983_v54, %v1084_v41 }
 0x147   : > { %v1079_v22 = vsel %vm1050_vm7, %v988_v52, %v1078_v58  ;;  %v1086_v35 = vsel %vm1050_vm7, %v989_v49, %v1085_v62  ;;  %1095 = vst [vmem:[%s180_s7 + $0x10] sm:$0xff] %v1065_v20  ;;  %1096 = vst [vmem:[%s180_s7 + $0x18] sm:$0xff] %v1072_v30 }
 0x148   : > { %1097 = vst [vmem:[%s180_s7 + $0x20] sm:$0xff] %v1079_v22  ;;  %1098 = vst [vmem:[%s180_s7 + $0x28] sm:$0xff] %v1086_v35 }
 0x149   : > { %1325 = shalt.err (!%p1322_p4)
}
 0x14a   : > { %s1326_s26 = scalar_lea.hbm %s2025_s17, 768  ;;  %s1330_s27 = scalar_lea.hbm %s2073_s2, 1536 }
 0x14b   : > { %p1327_p5 = scmp.ne.s32.totalorder %s2025_s17, %s1326_s26  ;;  %p1331_p1 = scmp.lt.u32.totalorder %s2025_s17, %s2073_s2 }
 0x14c   : > { %p1332_p3 = scmp.lt.u32.totalorder %s1330_s27, %s1326_s26  ;;  %p1334_p6 = scmp.lt.u32.totalorder %s1326_s26, %s2025_s17 }
 0x14d   : > { %p1328_p7 = pnand %p1327_p5, %p2117_p12 }
 0x14e   : > { %p1333_p11 = por %p1332_p3, %p1331_p1 }
 0x14f   : > { %p1329_p9 = pneg %p1328_p7 }
 0x150   : > { %p1335_p13 = por %p1334_p6, %p1333_p11 }
 0x152   : > { %p1336_p8 = pnand %p1335_p13, %p1329_p9 }
 0x154   : > { %1339 = shalt.err (!%p1336_p8)
}
 0x155   : > { %1217 = dma.vmem_to_hbm [thread:$0]  (%p2117_p12), %s2027_s14, 768, %s2025_s17, %s1100_s22  }
 0x156 PF: > { %s1126_s3 = sand.u32 1, %s1366_s9   ;;  %p2118_p10 = scmp.ne.s32.totalorder %s2087_s21, 0 }
 0x157   : > { %p2119_p0 = scmp.ge.s32.totalorder %s1378_s12, 2  ;;  %s1127_s6 = scalar_lea.sflag [#allocation4], %s1126_s3 }
 0x159   : > { %p1224_p2 = pnand %p2119_p0, %p2118_p10 }
 0x15b   : > { %1361 = dma.done.wait (!%p1224_p2), %s1127_s6, 768  }
 0x15c   : > { %1363 = vsyncadd (!%p1224_p2), %s1127_s6, 4294966528  ;;  %p15_p4 = scmp.ge.s32.totalorder %s1425_s15, 4   ;;  %s2120_s9 = smov %s1370_s10 }
 0x15d   : > { %s2121_s10 = smov %s1374_s11  ;;  %s2122_s11 = smov %s1437_s18 }
 0x15e   : > { %s2123_s12 = smov %s1425_s15  ;;  %17 = sbr.rel (!%p15_p4) target bundleno = 5 (0x5), region = 76 }
 0x165   :  { %1132 = vsyncpa [#allocation3], 1 }
 0x166   :  { %1134 = vsyncpa [#allocation3 + $0x1], 1 }
 0x167   :  { %1135 = vsyncpa [#allocation4], 1 }
 0x168   :  { %1137 = vsyncpa [#allocation4 + $0x1], 1 }

</bundles_post_ra>
